<compile_context>
chip_gen: v7x
topology: tpu7x:2x2x1
jax: 0.10.0
libtpu: 0.0.40
codegen_flags: <defaults>
</compile_context>

<pallas_src>
import jax
import jax.numpy as jnp
from jax.experimental import pallas as pl
from jax.experimental.pallas import tpu as pltpu


# ----------------------------------------------------------------------------
# Fused kernel: LSTMAttentionDot recurrence + TPR head, single invocation.
# ----------------------------------------------------------------------------
def _fused_decoder_kernel(gx_ref, h0_ref, c0_ref,
                          w_h_ref, rhs_cat_ref, mask_ref, ctx_out_ref,
                          m_cat_ref, wO_ref, bO_ref, rep3_ref, sel_bd_ref,
                          tT_ref, head_ref):
    S = gx_ref.shape[0]
    B, H = h0_ref.shape
    Lp = mask_ref.shape[1]              # lane-padded B*L (multiple of 128)
    dAO = m_cat_ref.shape[1] // 3
    dO = wO_ref.shape[1]
    dA3 = sel_bd_ref.shape[1]
    N = S * B
    f32 = jnp.float32
    bf16 = jnp.bfloat16

    # Recurrence constants, loaded once and VMEM/vreg resident (all bf16 MXU operands).
    w_h = w_h_ref[...]                  # (H, 4H)      bf16
    rhs_cat = rhs_cat_ref[...]          # (H, Lp + H)  bf16  [folded scores | w_out_h]
    mask = mask_ref[...]                # (B, Lp)      f32   0 on own block, -1e30 elsewhere
    ctx_out = ctx_out_ref[...]          # (Lp, H)      bf16  ctx_flat @ w_out_w (zero-padded)

    h = h0_ref[...]                     # (B, H) f32
    c = c0_ref[...]                     # (B, H) f32
    hs = []

    # --- time recurrence: fully unrolled static loop, all in registers ---
    for t in range(S):
        # Input projection was hoisted to the wrapper (both biases folded into gx);
        # only the h-dependent matmul is on the serial path.
        gates = gx_ref[t] + jnp.dot(h.astype(bf16), w_h,
                                    preferred_element_type=f32)        # (B, 4H) f32
        i_g = jax.nn.sigmoid(gates[:, 0:H])
        f_g = jax.nn.sigmoid(gates[:, H:2 * H])
        g_g = jnp.tanh(gates[:, 2 * H:3 * H])
        o_g = jax.nn.sigmoid(gates[:, 3 * H:4 * H])
        c = f_g * c + i_g * g_g
        hy = o_g * jnp.tanh(c)                                         # (B, H) f32

        # ONE merged hy-LHS MXU push: [attention scores | hy-projection of linear_out].
        proj = jnp.dot(hy.astype(bf16), rhs_cat,
                       preferred_element_type=f32)                     # (B, Lp + H) f32
        scores = proj[:, :Lp] + mask                                   # 128-lane-aligned slice
        scores = scores - jnp.max(scores, axis=-1, keepdims=True)
        e = jnp.exp(scores)                                            # masked cols underflow to 0
        attn = e * pl.reciprocal(jnp.sum(e, axis=-1, keepdims=True), approx=True)

        # h = tanh(weighted @ w_out_w + hy @ w_out_h) with w_out_w pre-folded into ctx_out.
        h = jnp.tanh(jnp.dot(attn.astype(bf16), ctx_out,
                             preferred_element_type=f32) + proj[:, Lp:])
        hs.append(h)                                                   # stays in vregs

    # One full-width unmasked store of all timesteps; head consumes the in-register value.
    x_all = jnp.concatenate(hs, axis=0)                                # (N, H) f32
    tT_ref[...] = x_all

    # --- fused TPR head on the (S*B, H) slab ---
    aos = jnp.dot(x_all.astype(bf16), m_cat_ref[...],
                  preferred_element_type=f32)                          # (N, 3*dAO) = [a1o|a2o|a3o]
    ao = aos[:, 0:dAO] + aos[:, dAO:2 * dAO] + aos[:, 2 * dAO:3 * dAO] # (N, dAO)
    to_plus = jnp.dot(ao.astype(bf16), wO_ref[...],
                      preferred_element_type=f32) + bO_ref[...]        # (N, dO)
    # NOTE: word_probs = F.softmax(to_plus) is never returned by the module -> omitted.
    tp_rep3 = jnp.dot(to_plus.astype(bf16), rep3_ref[...],
                      preferred_element_type=f32)                      # (N, 3*dAO) = [tp|tp|tp]
    # Lane-wise a1/a2/a3: block-diagonal sel keeps everything in packed lane order.
    a_cat = jnp.dot((aos * tp_rep3).astype(bf16), sel_bd_ref[...],
                    preferred_element_type=f32)                        # (N, 3*dA) = [a1|a2|a3]

    pad = head_ref.shape[1] - (dO + dA3)
    pieces = [to_plus, a_cat]
    if pad > 0:
        pieces.append(jnp.zeros((N, pad), f32))
    head_ref[...] = jnp.concatenate(pieces, axis=-1)                   # one lane-dense store


# ----------------------------------------------------------------------------
# Wrapper / glue (jitted; all folds one-time, at full precision, then cast bf16)
# ----------------------------------------------------------------------------
def _tpr_decoder_forward_impl(x, h0, c0, ctx_lbh, params, dims):
    """Forward of TPRdecoderForProgram (attention='dot', binary=False, dropout=0)."""
    dOpts, dArgs, dPoss = dims
    B, S, _ = x.shape
    H = dArgs * dOpts * dPoss
    L = ctx_lbh.shape[0]
    dAO = dArgs * dOpts
    f32 = jnp.float32
    bf16 = jnp.bfloat16
    HI = jax.lax.Precision.HIGHEST

    Lp = ((B * L + 127) // 128) * 128            # lane-padded attention width

    # Hoisted input projection, produced directly in (S, B, 4H) layout, biases folded.
    x_sm = jnp.transpose(x, (1, 0, 2))                                           # (S, B, in)
    gx = (jnp.dot(x_sm, params['W_in'].T, precision=HI)
          + (params['b_in'] + params['b_h'])).astype(f32)                        # (S, B, 4H)

    # Attention context (this is the module's ctx.transpose(0,1)).
    ctx_bm = jnp.transpose(ctx_lbh, (1, 0, 2))                                   # (B, L, H)
    ctx_flat = ctx_bm.reshape(B * L, H)                                          # (B*L, H)

    wo_T = params['W_att_out'].T                                                 # (2H, H)
    w_out_w = wo_T[:H]                                                           # weighted-ctx half
    w_out_h = wo_T[H:]                                                           # hy half

    # Fold W_att_in into the context: scores = hy @ scoresT.
    scoresT = jnp.dot(ctx_flat, params['W_att_in'], precision=HI).T              # (H, B*L)
    scoresT = jnp.pad(scoresT, ((0, 0), (0, Lp - B * L)))                        # (H, Lp)
    # Fold w_out_w into the context: h = tanh(attn @ ctx_out + hy @ w_out_h).
    ctx_out = jnp.dot(ctx_flat, w_out_w, precision=HI)                           # (B*L, H)
    ctx_out = jnp.pad(ctx_out, ((0, Lp - B * L), (0, 0))).astype(bf16)           # (Lp, H)
    # Merge the two hy-LHS matmuls into one push: [scores | hy-projection].
    rhs_cat = jnp.concatenate([scoresT, w_out_h], axis=1).astype(bf16)           # (H, Lp + H)

    # Additive mask: 0 on own batch's real columns, -1e30 on other batches AND pad lanes.
    col = jnp.arange(Lp, dtype=jnp.int32)
    own = (col[None, :] // L == jnp.arange(B, dtype=jnp.int32)[:, None]) & (col[None, :] < B * L)
    attn_mask = jnp.where(own, 0.0, -1e30).astype(f32)                           # (B, Lp)

    # TPR head constants (ur contractions / O_plus / <a_io, to_plus> as matmuls).
    eye_ao = jnp.eye(dAO, dtype=f32)
    m_cat = jnp.concatenate(
        [jnp.kron(eye_ao, params[k].reshape(dPoss, 1)) for k in ('ur1', 'ur2', 'ur3')],
        axis=1).astype(bf16)                                                     # (H, 3*dAO)
    rep = jnp.tile(jnp.eye(dOpts, dtype=f32), (1, dArgs))                        # (dO, dAO)
    rep3 = jnp.tile(rep, (1, 3)).astype(bf16)                                    # (dO, 3*dAO)
    sel = jnp.kron(jnp.eye(dArgs, dtype=f32), jnp.ones((dOpts, 1), f32))         # (dAO, dA)
    sel_bd = jnp.kron(jnp.eye(3, dtype=f32), sel).astype(bf16)                   # (3*dAO, 3*dA)

    head_w = ((dOpts + 3 * dArgs + 127) // 128) * 128        # lane-dense packed width

    vmem = pl.BlockSpec(memory_space=pltpu.MemorySpace.VMEM)
    tT_flat, head = pl.pallas_call(
        _fused_decoder_kernel,
        out_shape=(jax.ShapeDtypeStruct((S * B, H), f32),
                   jax.ShapeDtypeStruct((S * B, head_w), f32)),
        in_specs=[vmem] * 12,
        out_specs=(vmem, vmem),
    )(gx, h0, c0,
      params['W_h'].T.astype(bf16), rhs_cat, attn_mask, ctx_out,
      m_cat, params['W_O'].T.astype(bf16), params['b_O'].reshape(1, -1).astype(f32),
      rep3, sel_bd)

    tT = tT_flat.reshape(S, B, H).transpose(1, 0, 2)                             # (B, S, H)
    head = head.reshape(S, B, head_w).transpose(1, 0, 2)                         # (B, S, head_w)
    to_plus = head[:, :, :dOpts]
    a1 = head[:, :, dOpts:dOpts + dArgs]
    a2 = head[:, :, dOpts + dArgs:dOpts + 2 * dArgs]
    a3 = head[:, :, dOpts + 2 * dArgs:dOpts + 3 * dArgs]
    return tT, to_plus, a1, a2, a3


tpr_decoder_forward = jax.jit(_tpr_decoder_forward_impl, static_argnums=(5,))


# ----------------------------------------------------------------------------
# Pure-JAX reference (mirrors the PyTorch module; run at 'highest' precision)
# ----------------------------------------------------------------------------
def reference_forward(x, h0, c0, ctx_lbh, p, dims):
    dOpts, dArgs, dPoss = dims
    B, S, _ = x.shape
    ctx = jnp.transpose(ctx_lbh, (1, 0, 2))     # (B, L, H)

    def step(carry, x_t):
        h, c = carry
        gates = x_t @ p['W_in'].T + p['b_in'] + h @ p['W_h'].T + p['b_h']
        i, f, g, o = jnp.split(gates, 4, axis=1)
        i = jax.nn.sigmoid(i)
        f = jax.nn.sigmoid(f)
        g = jnp.tanh(g)
        o = jax.nn.sigmoid(o)
        c_new = f * c + i * g
        hy = o * jnp.tanh(c_new)
        target = hy @ p['W_att_in'].T
        logits = jnp.einsum('blh,bh->bl', ctx, target)
        attn = jax.nn.softmax(logits, axis=-1)
        weighted = jnp.einsum('bl,blh->bh', attn, ctx)
        h_tilde = jnp.tanh(jnp.concatenate([weighted, hy], axis=1) @ p['W_att_out'].T)
        return (h_tilde, c_new), h_tilde

    x_tm = jnp.transpose(x, (1, 0, 2))
    _, outs = jax.lax.scan(step, (h0, c0), x_tm)
    tT = jnp.transpose(outs, (1, 0, 2))                       # (B, S, H)
    tT_r = tT.reshape(B, S, dArgs, dOpts, dPoss)
    a1o = tT_r @ p['ur1']
    a2o = tT_r @ p['ur2']
    a3o = tT_r @ p['ur3']
    ao = a1o + a2o + a3o
    to_plus = ao.reshape(B, S, dArgs * dOpts) @ p['W_O'].T + p['b_O']
    a1 = jnp.einsum('bsao,bso->bsa', a1o, to_plus)
    a2 = jnp.einsum('bsao,bso->bsa', a2o, to_plus)
    a3 = jnp.einsum('bsao,bso->bsa', a3o, to_plus)
    return tT, to_plus, a1, a2, a3


if __name__ == "__main__":
    # Small, TPU-friendly shapes consistent with the module.
    B, S, L = 2, 4, 6
    in_dim = 32
    dOpts, dArgs, dPoss = 8, 4, 4
    H = dArgs * dOpts * dPoss        # 128

    key = jax.random.PRNGKey(0)
    keys = jax.random.split(key, 14)

    def lin_w(k, out_f, in_f):
        bound = 1.0 / (in_f ** 0.5)
        return jax.random.uniform(k, (out_f, in_f), jnp.float32, -bound, bound)

    def lin_b(k, out_f, in_f):
        bound = 1.0 / (in_f ** 0.5)
        return jax.random.uniform(k, (out_f,), jnp.float32, -bound, bound)

    params = {
        'W_in': lin_w(keys[0], 4 * H, in_dim),   'b_in': lin_b(keys[1], 4 * H, in_dim),
        'W_h': lin_w(keys[2], 4 * H, H),         'b_h': lin_b(keys[3], 4 * H, H),
        'W_att_in': lin_w(keys[4], H, H),                       # linear_in (no bias)
        'W_att_out': lin_w(keys[5], H, 2 * H),                  # linear_out (no bias)
        'W_O': lin_w(keys[6], dOpts, dArgs * dOpts),
        'b_O': lin_b(keys[7], dOpts, dArgs * dOpts),
        'ur1': jax.random.uniform(keys[8], (dPoss,), jnp.float32),
        'ur2': jax.random.uniform(keys[9], (dPoss,), jnp.float32),
        'ur3': jax.random.uniform(keys[10], (dPoss,), jnp.float32),
    }

    x = jax.random.normal(keys[11], (B, S, in_dim), jnp.float32)
    ctx = jax.random.normal(keys[12], (L, B, H), jnp.float32)   # seq-major encoder context
    h0 = jnp.zeros((B, H), jnp.float32)
    c0 = jnp.zeros((B, H), jnp.float32)

    dims = (dOpts, dArgs, dPoss)
    outs = tpr_decoder_forward(x, h0, c0, ctx, params, dims)
    outs = jax.block_until_ready(outs)

    # Reference at explicit 'highest' precision (scoped: does NOT affect the kernel's dots).
    with jax.default_matmul_precision('highest'):
        refs = reference_forward(x, h0, c0, ctx, params, dims)
    refs = jax.block_until_ready(refs)

    # The kernel intentionally uses bf16 MXU operands (single-pass matmuls) with f32
    # accumulation, so compare with a tolerance scaled to each output's magnitude.
    for got, exp, name in zip(outs, refs, ("tT", "to_plus", "a1", "a2", "a3")):
        err = float(jnp.max(jnp.abs(got - exp)))
        tol = 3e-2 * max(1.0, float(jnp.max(jnp.abs(exp))))
        assert err < tol, f"{name} mismatch: max abs err {err} (tol {tol})"

    print("KERNEL_OK")
</pallas_src>

<mosaic_0001>
module attributes {stable_mosaic.version = 11 : i64} {
  func.func @_fused_decoder_kernel(%arg0: memref<4x2x512xf32, #tpu.memory_space<vmem>>, %arg1: memref<2x128xf32, #tpu.memory_space<vmem>>, %arg2: memref<2x128xf32, #tpu.memory_space<vmem>>, %arg3: memref<128x512xbf16, #tpu.memory_space<vmem>>, %arg4: memref<128x256xbf16, #tpu.memory_space<vmem>>, %arg5: memref<2x128xf32, #tpu.memory_space<vmem>>, %arg6: memref<128x128xbf16, #tpu.memory_space<vmem>>, %arg7: memref<128x96xbf16, #tpu.memory_space<vmem>>, %arg8: memref<32x8xbf16, #tpu.memory_space<vmem>>, %arg9: memref<1x8xf32, #tpu.memory_space<vmem>>, %arg10: memref<8x96xbf16, #tpu.memory_space<vmem>>, %arg11: memref<96x12xbf16, #tpu.memory_space<vmem>>, %arg12: memref<8x128xf32, #tpu.memory_space<vmem>>, %arg13: memref<8x128xf32, #tpu.memory_space<vmem>>) attributes {dimension_semantics = [], scalar_prefetch = 0 : i64, scratch_operands = 0 : i64, tpu.core_type = #tpu.core_type<tc>} {
    %c0 = arith.constant 0 : index
    %c0_0 = arith.constant 0 : index
    %0 = vector.load %arg3[%c0, %c0_0] : memref<128x512xbf16, #tpu.memory_space<vmem>>, vector<128x512xbf16>
    %c0_1 = arith.constant 0 : index
    %c0_2 = arith.constant 0 : index
    %1 = vector.load %arg4[%c0_1, %c0_2] : memref<128x256xbf16, #tpu.memory_space<vmem>>, vector<128x256xbf16>
    %c0_3 = arith.constant 0 : index
    %c0_4 = arith.constant 0 : index
    %2 = vector.load %arg5[%c0_3, %c0_4] : memref<2x128xf32, #tpu.memory_space<vmem>>, vector<2x128xf32>
    %c0_5 = arith.constant 0 : index
    %c0_6 = arith.constant 0 : index
    %3 = vector.load %arg6[%c0_5, %c0_6] : memref<128x128xbf16, #tpu.memory_space<vmem>>, vector<128x128xbf16>
    %c0_7 = arith.constant 0 : index
    %c0_8 = arith.constant 0 : index
    %4 = vector.load %arg1[%c0_7, %c0_8] : memref<2x128xf32, #tpu.memory_space<vmem>>, vector<2x128xf32>
    %c0_9 = arith.constant 0 : index
    %c0_10 = arith.constant 0 : index
    %5 = vector.load %arg2[%c0_9, %c0_10] : memref<2x128xf32, #tpu.memory_space<vmem>>, vector<2x128xf32>
    %c0_11 = arith.constant 0 : index
    %c0_12 = arith.constant 0 : index
    %c0_13 = arith.constant 0 : index
    %6 = vector.load %arg0[%c0_11, %c0_12, %c0_13] : memref<4x2x512xf32, #tpu.memory_space<vmem>>, vector<1x2x512xf32>
    %7 = vector.shape_cast %6 : vector<1x2x512xf32> to vector<2x512xf32>
    %8 = arith.truncf %4 : vector<2x128xf32> to vector<2x128xbf16>
    %cst = arith.constant dense<0.000000e+00> : vector<2x512xf32>
    %9 = tpu.matmul %8, %0, %cst {dimension_numbers = #tpu.dot_dimension_numbers<[1], [0], [0], [1], [0, 0, 1, 1], [], []>} : vector<2x128xbf16>, vector<128x512xbf16>, vector<2x512xf32> -> vector<2x512xf32>
    %10 = arith.addf %7, %9 : vector<2x512xf32>
    %11 = vector.extract_strided_slice %10 {offsets = [0, 0], sizes = [2, 128], strides = [1, 1]} : vector<2x512xf32> to vector<2x128xf32>
    %12 = arith.negf %11 : vector<2x128xf32>
    %13 = math.exp %12 : vector<2x128xf32>
    %cst_14 = arith.constant 1.000000e+00 : f32
    %14 = vector.broadcast %cst_14 : f32 to vector<2x128xf32>
    %15 = arith.addf %14, %13 : vector<2x128xf32>
    %16 = arith.divf %14, %15 : vector<2x128xf32>
    %17 = vector.extract_strided_slice %10 {offsets = [0, 128], sizes = [2, 128], strides = [1, 1]} : vector<2x512xf32> to vector<2x128xf32>
    %18 = arith.negf %17 : vector<2x128xf32>
    %19 = math.exp %18 : vector<2x128xf32>
    %cst_15 = arith.constant 1.000000e+00 : f32
    %20 = vector.broadcast %cst_15 : f32 to vector<2x128xf32>
    %21 = arith.addf %20, %19 : vector<2x128xf32>
    %22 = arith.divf %20, %21 : vector<2x128xf32>
    %23 = vector.extract_strided_slice %10 {offsets = [0, 256], sizes = [2, 128], strides = [1, 1]} : vector<2x512xf32> to vector<2x128xf32>
    %24 = math.tanh %23 : vector<2x128xf32>
    %25 = vector.extract_strided_slice %10 {offsets = [0, 384], sizes = [2, 128], strides = [1, 1]} : vector<2x512xf32> to vector<2x128xf32>
    %26 = arith.negf %25 : vector<2x128xf32>
    %27 = math.exp %26 : vector<2x128xf32>
    %cst_16 = arith.constant 1.000000e+00 : f32
    %28 = vector.broadcast %cst_16 : f32 to vector<2x128xf32>
    %29 = arith.addf %28, %27 : vector<2x128xf32>
    %30 = arith.divf %28, %29 : vector<2x128xf32>
    %31 = arith.mulf %22, %5 : vector<2x128xf32>
    %32 = arith.mulf %16, %24 : vector<2x128xf32>
    %33 = arith.addf %31, %32 : vector<2x128xf32>
    %34 = math.tanh %33 : vector<2x128xf32>
    %35 = arith.mulf %30, %34 : vector<2x128xf32>
    %36 = arith.truncf %35 : vector<2x128xf32> to vector<2x128xbf16>
    %cst_17 = arith.constant dense<0.000000e+00> : vector<2x256xf32>
    %37 = tpu.matmul %36, %1, %cst_17 {dimension_numbers = #tpu.dot_dimension_numbers<[1], [0], [0], [1], [0, 0, 1, 1], [], []>} : vector<2x128xbf16>, vector<128x256xbf16>, vector<2x256xf32> -> vector<2x256xf32>
    %38 = vector.extract_strided_slice %37 {offsets = [0, 0], sizes = [2, 128], strides = [1, 1]} : vector<2x256xf32> to vector<2x128xf32>
    %39 = arith.addf %38, %2 : vector<2x128xf32>
    %cst_18 = arith.constant dense<0xFF800000> : vector<2xf32>
    %40 = vector.multi_reduction <maximumf>, %39, %cst_18 [1] : vector<2x128xf32> to vector<2xf32>
    %41 = vector.shape_cast %40 : vector<2xf32> to vector<2x1xf32>
    %42 = vector.broadcast %41 : vector<2x1xf32> to vector<2x128xf32>
    %43 = arith.subf %39, %42 : vector<2x128xf32>
    %44 = math.exp %43 : vector<2x128xf32>
    %cst_19 = arith.constant dense<0.000000e+00> : vector<2xf32>
    %45 = vector.multi_reduction <add>, %44, %cst_19 [1] : vector<2x128xf32> to vector<2xf32>
    %46 = vector.shape_cast %45 : vector<2xf32> to vector<2x1xf32>
    %47 = tpu.reciprocal %46 {approx = true} : vector<2x1xf32> -> vector<2x1xf32>
    %48 = vector.broadcast %47 : vector<2x1xf32> to vector<2x128xf32>
    %49 = arith.mulf %44, %48 : vector<2x128xf32>
    %50 = arith.truncf %49 : vector<2x128xf32> to vector<2x128xbf16>
    %cst_20 = arith.constant dense<0.000000e+00> : vector<2x128xf32>
    %51 = tpu.matmul %50, %3, %cst_20 {dimension_numbers = #tpu.dot_dimension_numbers<[1], [0], [0], [1], [0, 0, 1, 1], [], []>} : vector<2x128xbf16>, vector<128x128xbf16>, vector<2x128xf32> -> vector<2x128xf32>
    %52 = vector.extract_strided_slice %37 {offsets = [0, 128], sizes = [2, 128], strides = [1, 1]} : vector<2x256xf32> to vector<2x128xf32>
    %53 = arith.addf %51, %52 : vector<2x128xf32>
    %54 = math.tanh %53 : vector<2x128xf32>
    %c1 = arith.constant 1 : index
    %c0_21 = arith.constant 0 : index
    %c0_22 = arith.constant 0 : index
    %55 = vector.load %arg0[%c1, %c0_21, %c0_22] : memref<4x2x512xf32, #tpu.memory_space<vmem>>, vector<1x2x512xf32>
    %56 = vector.shape_cast %55 : vector<1x2x512xf32> to vector<2x512xf32>
    %57 = arith.truncf %54 : vector<2x128xf32> to vector<2x128xbf16>
    %cst_23 = arith.constant dense<0.000000e+00> : vector<2x512xf32>
    %58 = tpu.matmul %57, %0, %cst_23 {dimension_numbers = #tpu.dot_dimension_numbers<[1], [0], [0], [1], [0, 0, 1, 1], [], []>} : vector<2x128xbf16>, vector<128x512xbf16>, vector<2x512xf32> -> vector<2x512xf32>
    %59 = arith.addf %56, %58 : vector<2x512xf32>
    %60 = vector.extract_strided_slice %59 {offsets = [0, 0], sizes = [2, 128], strides = [1, 1]} : vector<2x512xf32> to vector<2x128xf32>
    %61 = arith.negf %60 : vector<2x128xf32>
    %62 = math.exp %61 : vector<2x128xf32>
    %cst_24 = arith.constant 1.000000e+00 : f32
    %63 = vector.broadcast %cst_24 : f32 to vector<2x128xf32>
    %64 = arith.addf %63, %62 : vector<2x128xf32>
    %65 = arith.divf %63, %64 : vector<2x128xf32>
    %66 = vector.extract_strided_slice %59 {offsets = [0, 128], sizes = [2, 128], strides = [1, 1]} : vector<2x512xf32> to vector<2x128xf32>
    %67 = arith.negf %66 : vector<2x128xf32>
    %68 = math.exp %67 : vector<2x128xf32>
    %cst_25 = arith.constant 1.000000e+00 : f32
    %69 = vector.broadcast %cst_25 : f32 to vector<2x128xf32>
    %70 = arith.addf %69, %68 : vector<2x128xf32>
    %71 = arith.divf %69, %70 : vector<2x128xf32>
    %72 = vector.extract_strided_slice %59 {offsets = [0, 256], sizes = [2, 128], strides = [1, 1]} : vector<2x512xf32> to vector<2x128xf32>
    %73 = math.tanh %72 : vector<2x128xf32>
    %74 = vector.extract_strided_slice %59 {offsets = [0, 384], sizes = [2, 128], strides = [1, 1]} : vector<2x512xf32> to vector<2x128xf32>
    %75 = arith.negf %74 : vector<2x128xf32>
    %76 = math.exp %75 : vector<2x128xf32>
    %cst_26 = arith.constant 1.000000e+00 : f32
    %77 = vector.broadcast %cst_26 : f32 to vector<2x128xf32>
    %78 = arith.addf %77, %76 : vector<2x128xf32>
    %79 = arith.divf %77, %78 : vector<2x128xf32>
    %80 = arith.mulf %71, %33 : vector<2x128xf32>
    %81 = arith.mulf %65, %73 : vector<2x128xf32>
    %82 = arith.addf %80, %81 : vector<2x128xf32>
    %83 = math.tanh %82 : vector<2x128xf32>
    %84 = arith.mulf %79, %83 : vector<2x128xf32>
    %85 = arith.truncf %84 : vector<2x128xf32> to vector<2x128xbf16>
    %cst_27 = arith.constant dense<0.000000e+00> : vector<2x256xf32>
    %86 = tpu.matmul %85, %1, %cst_27 {dimension_numbers = #tpu.dot_dimension_numbers<[1], [0], [0], [1], [0, 0, 1, 1], [], []>} : vector<2x128xbf16>, vector<128x256xbf16>, vector<2x256xf32> -> vector<2x256xf32>
    %87 = vector.extract_strided_slice %86 {offsets = [0, 0], sizes = [2, 128], strides = [1, 1]} : vector<2x256xf32> to vector<2x128xf32>
    %88 = arith.addf %87, %2 : vector<2x128xf32>
    %cst_28 = arith.constant dense<0xFF800000> : vector<2xf32>
    %89 = vector.multi_reduction <maximumf>, %88, %cst_28 [1] : vector<2x128xf32> to vector<2xf32>
    %90 = vector.shape_cast %89 : vector<2xf32> to vector<2x1xf32>
    %91 = vector.broadcast %90 : vector<2x1xf32> to vector<2x128xf32>
    %92 = arith.subf %88, %91 : vector<2x128xf32>
    %93 = math.exp %92 : vector<2x128xf32>
    %cst_29 = arith.constant dense<0.000000e+00> : vector<2xf32>
    %94 = vector.multi_reduction <add>, %93, %cst_29 [1] : vector<2x128xf32> to vector<2xf32>
    %95 = vector.shape_cast %94 : vector<2xf32> to vector<2x1xf32>
    %96 = tpu.reciprocal %95 {approx = true} : vector<2x1xf32> -> vector<2x1xf32>
    %97 = vector.broadcast %96 : vector<2x1xf32> to vector<2x128xf32>
    %98 = arith.mulf %93, %97 : vector<2x128xf32>
    %99 = arith.truncf %98 : vector<2x128xf32> to vector<2x128xbf16>
    %cst_30 = arith.constant dense<0.000000e+00> : vector<2x128xf32>
    %100 = tpu.matmul %99, %3, %cst_30 {dimension_numbers = #tpu.dot_dimension_numbers<[1], [0], [0], [1], [0, 0, 1, 1], [], []>} : vector<2x128xbf16>, vector<128x128xbf16>, vector<2x128xf32> -> vector<2x128xf32>
    %101 = vector.extract_strided_slice %86 {offsets = [0, 128], sizes = [2, 128], strides = [1, 1]} : vector<2x256xf32> to vector<2x128xf32>
    %102 = arith.addf %100, %101 : vector<2x128xf32>
    %103 = math.tanh %102 : vector<2x128xf32>
    %c2 = arith.constant 2 : index
    %c0_31 = arith.constant 0 : index
    %c0_32 = arith.constant 0 : index
    %104 = vector.load %arg0[%c2, %c0_31, %c0_32] : memref<4x2x512xf32, #tpu.memory_space<vmem>>, vector<1x2x512xf32>
    %105 = vector.shape_cast %104 : vector<1x2x512xf32> to vector<2x512xf32>
    %106 = arith.truncf %103 : vector<2x128xf32> to vector<2x128xbf16>
    %cst_33 = arith.constant dense<0.000000e+00> : vector<2x512xf32>
    %107 = tpu.matmul %106, %0, %cst_33 {dimension_numbers = #tpu.dot_dimension_numbers<[1], [0], [0], [1], [0, 0, 1, 1], [], []>} : vector<2x128xbf16>, vector<128x512xbf16>, vector<2x512xf32> -> vector<2x512xf32>
    %108 = arith.addf %105, %107 : vector<2x512xf32>
    %109 = vector.extract_strided_slice %108 {offsets = [0, 0], sizes = [2, 128], strides = [1, 1]} : vector<2x512xf32> to vector<2x128xf32>
    %110 = arith.negf %109 : vector<2x128xf32>
    %111 = math.exp %110 : vector<2x128xf32>
    %cst_34 = arith.constant 1.000000e+00 : f32
    %112 = vector.broadcast %cst_34 : f32 to vector<2x128xf32>
    %113 = arith.addf %112, %111 : vector<2x128xf32>
    %114 = arith.divf %112, %113 : vector<2x128xf32>
    %115 = vector.extract_strided_slice %108 {offsets = [0, 128], sizes = [2, 128], strides = [1, 1]} : vector<2x512xf32> to vector<2x128xf32>
    %116 = arith.negf %115 : vector<2x128xf32>
    %117 = math.exp %116 : vector<2x128xf32>
    %cst_35 = arith.constant 1.000000e+00 : f32
    %118 = vector.broadcast %cst_35 : f32 to vector<2x128xf32>
    %119 = arith.addf %118, %117 : vector<2x128xf32>
    %120 = arith.divf %118, %119 : vector<2x128xf32>
    %121 = vector.extract_strided_slice %108 {offsets = [0, 256], sizes = [2, 128], strides = [1, 1]} : vector<2x512xf32> to vector<2x128xf32>
    %122 = math.tanh %121 : vector<2x128xf32>
    %123 = vector.extract_strided_slice %108 {offsets = [0, 384], sizes = [2, 128], strides = [1, 1]} : vector<2x512xf32> to vector<2x128xf32>
    %124 = arith.negf %123 : vector<2x128xf32>
    %125 = math.exp %124 : vector<2x128xf32>
    %cst_36 = arith.constant 1.000000e+00 : f32
    %126 = vector.broadcast %cst_36 : f32 to vector<2x128xf32>
    %127 = arith.addf %126, %125 : vector<2x128xf32>
    %128 = arith.divf %126, %127 : vector<2x128xf32>
    %129 = arith.mulf %120, %82 : vector<2x128xf32>
    %130 = arith.mulf %114, %122 : vector<2x128xf32>
    %131 = arith.addf %129, %130 : vector<2x128xf32>
    %132 = math.tanh %131 : vector<2x128xf32>
    %133 = arith.mulf %128, %132 : vector<2x128xf32>
    %134 = arith.truncf %133 : vector<2x128xf32> to vector<2x128xbf16>
    %cst_37 = arith.constant dense<0.000000e+00> : vector<2x256xf32>
    %135 = tpu.matmul %134, %1, %cst_37 {dimension_numbers = #tpu.dot_dimension_numbers<[1], [0], [0], [1], [0, 0, 1, 1], [], []>} : vector<2x128xbf16>, vector<128x256xbf16>, vector<2x256xf32> -> vector<2x256xf32>
    %136 = vector.extract_strided_slice %135 {offsets = [0, 0], sizes = [2, 128], strides = [1, 1]} : vector<2x256xf32> to vector<2x128xf32>
    %137 = arith.addf %136, %2 : vector<2x128xf32>
    %cst_38 = arith.constant dense<0xFF800000> : vector<2xf32>
    %138 = vector.multi_reduction <maximumf>, %137, %cst_38 [1] : vector<2x128xf32> to vector<2xf32>
    %139 = vector.shape_cast %138 : vector<2xf32> to vector<2x1xf32>
    %140 = vector.broadcast %139 : vector<2x1xf32> to vector<2x128xf32>
    %141 = arith.subf %137, %140 : vector<2x128xf32>
    %142 = math.exp %141 : vector<2x128xf32>
    %cst_39 = arith.constant dense<0.000000e+00> : vector<2xf32>
    %143 = vector.multi_reduction <add>, %142, %cst_39 [1] : vector<2x128xf32> to vector<2xf32>
    %144 = vector.shape_cast %143 : vector<2xf32> to vector<2x1xf32>
    %145 = tpu.reciprocal %144 {approx = true} : vector<2x1xf32> -> vector<2x1xf32>
    %146 = vector.broadcast %145 : vector<2x1xf32> to vector<2x128xf32>
    %147 = arith.mulf %142, %146 : vector<2x128xf32>
    %148 = arith.truncf %147 : vector<2x128xf32> to vector<2x128xbf16>
    %cst_40 = arith.constant dense<0.000000e+00> : vector<2x128xf32>
    %149 = tpu.matmul %148, %3, %cst_40 {dimension_numbers = #tpu.dot_dimension_numbers<[1], [0], [0], [1], [0, 0, 1, 1], [], []>} : vector<2x128xbf16>, vector<128x128xbf16>, vector<2x128xf32> -> vector<2x128xf32>
    %150 = vector.extract_strided_slice %135 {offsets = [0, 128], sizes = [2, 128], strides = [1, 1]} : vector<2x256xf32> to vector<2x128xf32>
    %151 = arith.addf %149, %150 : vector<2x128xf32>
    %152 = math.tanh %151 : vector<2x128xf32>
    %c3 = arith.constant 3 : index
    %c0_41 = arith.constant 0 : index
    %c0_42 = arith.constant 0 : index
    %153 = vector.load %arg0[%c3, %c0_41, %c0_42] : memref<4x2x512xf32, #tpu.memory_space<vmem>>, vector<1x2x512xf32>
    %154 = vector.shape_cast %153 : vector<1x2x512xf32> to vector<2x512xf32>
    %155 = arith.truncf %152 : vector<2x128xf32> to vector<2x128xbf16>
    %cst_43 = arith.constant dense<0.000000e+00> : vector<2x512xf32>
    %156 = tpu.matmul %155, %0, %cst_43 {dimension_numbers = #tpu.dot_dimension_numbers<[1], [0], [0], [1], [0, 0, 1, 1], [], []>} : vector<2x128xbf16>, vector<128x512xbf16>, vector<2x512xf32> -> vector<2x512xf32>
    %157 = arith.addf %154, %156 : vector<2x512xf32>
    %158 = vector.extract_strided_slice %157 {offsets = [0, 0], sizes = [2, 128], strides = [1, 1]} : vector<2x512xf32> to vector<2x128xf32>
    %159 = arith.negf %158 : vector<2x128xf32>
    %160 = math.exp %159 : vector<2x128xf32>
    %cst_44 = arith.constant 1.000000e+00 : f32
    %161 = vector.broadcast %cst_44 : f32 to vector<2x128xf32>
    %162 = arith.addf %161, %160 : vector<2x128xf32>
    %163 = arith.divf %161, %162 : vector<2x128xf32>
    %164 = vector.extract_strided_slice %157 {offsets = [0, 128], sizes = [2, 128], strides = [1, 1]} : vector<2x512xf32> to vector<2x128xf32>
    %165 = arith.negf %164 : vector<2x128xf32>
    %166 = math.exp %165 : vector<2x128xf32>
    %cst_45 = arith.constant 1.000000e+00 : f32
    %167 = vector.broadcast %cst_45 : f32 to vector<2x128xf32>
    %168 = arith.addf %167, %166 : vector<2x128xf32>
    %169 = arith.divf %167, %168 : vector<2x128xf32>
    %170 = vector.extract_strided_slice %157 {offsets = [0, 256], sizes = [2, 128], strides = [1, 1]} : vector<2x512xf32> to vector<2x128xf32>
    %171 = math.tanh %170 : vector<2x128xf32>
    %172 = vector.extract_strided_slice %157 {offsets = [0, 384], sizes = [2, 128], strides = [1, 1]} : vector<2x512xf32> to vector<2x128xf32>
    %173 = arith.negf %172 : vector<2x128xf32>
    %174 = math.exp %173 : vector<2x128xf32>
    %cst_46 = arith.constant 1.000000e+00 : f32
    %175 = vector.broadcast %cst_46 : f32 to vector<2x128xf32>
    %176 = arith.addf %175, %174 : vector<2x128xf32>
    %177 = arith.divf %175, %176 : vector<2x128xf32>
    %178 = arith.mulf %169, %131 : vector<2x128xf32>
    %179 = arith.mulf %163, %171 : vector<2x128xf32>
    %180 = arith.addf %178, %179 : vector<2x128xf32>
    %181 = math.tanh %180 : vector<2x128xf32>
    %182 = arith.mulf %177, %181 : vector<2x128xf32>
    %183 = arith.truncf %182 : vector<2x128xf32> to vector<2x128xbf16>
    %cst_47 = arith.constant dense<0.000000e+00> : vector<2x256xf32>
    %184 = tpu.matmul %183, %1, %cst_47 {dimension_numbers = #tpu.dot_dimension_numbers<[1], [0], [0], [1], [0, 0, 1, 1], [], []>} : vector<2x128xbf16>, vector<128x256xbf16>, vector<2x256xf32> -> vector<2x256xf32>
    %185 = vector.extract_strided_slice %184 {offsets = [0, 0], sizes = [2, 128], strides = [1, 1]} : vector<2x256xf32> to vector<2x128xf32>
    %186 = arith.addf %185, %2 : vector<2x128xf32>
    %cst_48 = arith.constant dense<0xFF800000> : vector<2xf32>
    %187 = vector.multi_reduction <maximumf>, %186, %cst_48 [1] : vector<2x128xf32> to vector<2xf32>
    %188 = vector.shape_cast %187 : vector<2xf32> to vector<2x1xf32>
    %189 = vector.broadcast %188 : vector<2x1xf32> to vector<2x128xf32>
    %190 = arith.subf %186, %189 : vector<2x128xf32>
    %191 = math.exp %190 : vector<2x128xf32>
    %cst_49 = arith.constant dense<0.000000e+00> : vector<2xf32>
    %192 = vector.multi_reduction <add>, %191, %cst_49 [1] : vector<2x128xf32> to vector<2xf32>
    %193 = vector.shape_cast %192 : vector<2xf32> to vector<2x1xf32>
    %194 = tpu.reciprocal %193 {approx = true} : vector<2x1xf32> -> vector<2x1xf32>
    %195 = vector.broadcast %194 : vector<2x1xf32> to vector<2x128xf32>
    %196 = arith.mulf %191, %195 : vector<2x128xf32>
    %197 = arith.truncf %196 : vector<2x128xf32> to vector<2x128xbf16>
    %cst_50 = arith.constant dense<0.000000e+00> : vector<2x128xf32>
    %198 = tpu.matmul %197, %3, %cst_50 {dimension_numbers = #tpu.dot_dimension_numbers<[1], [0], [0], [1], [0, 0, 1, 1], [], []>} : vector<2x128xbf16>, vector<128x128xbf16>, vector<2x128xf32> -> vector<2x128xf32>
    %199 = vector.extract_strided_slice %184 {offsets = [0, 128], sizes = [2, 128], strides = [1, 1]} : vector<2x256xf32> to vector<2x128xf32>
    %200 = arith.addf %198, %199 : vector<2x128xf32>
    %201 = math.tanh %200 : vector<2x128xf32>
    %202 = tpu.concatenate %54, %103, %152, %201 in 0 : vector<2x128xf32>, vector<2x128xf32>, vector<2x128xf32>, vector<2x128xf32> -> vector<8x128xf32>
    %c0_51 = arith.constant 0 : index
    %c0_52 = arith.constant 0 : index
    %203 = vector.load %arg12[%c0_51, %c0_52] : memref<8x128xf32, #tpu.memory_space<vmem>>, vector<8x128xf32>
    tpu.vector_store %arg12[%c0_51, %c0_52], %202 {strides = array<i32>} : memref<8x128xf32, #tpu.memory_space<vmem>>, vector<8x128xf32>,
    %204 = arith.truncf %202 : vector<8x128xf32> to vector<8x128xbf16>
    %c0_53 = arith.constant 0 : index
    %c0_54 = arith.constant 0 : index
    %205 = vector.load %arg7[%c0_53, %c0_54] : memref<128x96xbf16, #tpu.memory_space<vmem>>, vector<128x96xbf16>
    %cst_55 = arith.constant dense<0.000000e+00> : vector<8x96xf32>
    %206 = tpu.matmul %204, %205, %cst_55 {dimension_numbers = #tpu.dot_dimension_numbers<[1], [0], [0], [1], [0, 0, 1, 1], [], []>} : vector<8x128xbf16>, vector<128x96xbf16>, vector<8x96xf32> -> vector<8x96xf32>
    %207 = vector.extract_strided_slice %206 {offsets = [0, 0], sizes = [8, 32], strides = [1, 1]} : vector<8x96xf32> to vector<8x32xf32>
    %208 = vector.extract_strided_slice %206 {offsets = [0, 32], sizes = [8, 32], strides = [1, 1]} : vector<8x96xf32> to vector<8x32xf32>
    %209 = arith.addf %207, %208 : vector<8x32xf32>
    %210 = vector.extract_strided_slice %206 {offsets = [0, 64], sizes = [8, 32], strides = [1, 1]} : vector<8x96xf32> to vector<8x32xf32>
    %211 = arith.addf %209, %210 : vector<8x32xf32>
    %212 = arith.truncf %211 : vector<8x32xf32> to vector<8x32xbf16>
    %c0_56 = arith.constant 0 : index
    %c0_57 = arith.constant 0 : index
    %213 = vector.load %arg8[%c0_56, %c0_57] : memref<32x8xbf16, #tpu.memory_space<vmem>>, vector<32x8xbf16>
    %cst_58 = arith.constant dense<0.000000e+00> : vector<8x8xf32>
    %214 = tpu.matmul %212, %213, %cst_58 {dimension_numbers = #tpu.dot_dimension_numbers<[1], [0], [0], [1], [0, 0, 1, 1], [], []>} : vector<8x32xbf16>, vector<32x8xbf16>, vector<8x8xf32> -> vector<8x8xf32>
    %c0_59 = arith.constant 0 : index
    %c0_60 = arith.constant 0 : index
    %215 = vector.load %arg9[%c0_59, %c0_60] : memref<1x8xf32, #tpu.memory_space<vmem>>, vector<1x8xf32>
    %216 = vector.broadcast %215 : vector<1x8xf32> to vector<8x8xf32>
    %217 = arith.addf %214, %216 : vector<8x8xf32>
    %218 = arith.truncf %217 : vector<8x8xf32> to vector<8x8xbf16>
    %c0_61 = arith.constant 0 : index
    %c0_62 = arith.constant 0 : index
    %219 = vector.load %arg10[%c0_61, %c0_62] : memref<8x96xbf16, #tpu.memory_space<vmem>>, vector<8x96xbf16>
    %cst_63 = arith.constant dense<0.000000e+00> : vector<8x96xf32>
    %220 = tpu.matmul %218, %219, %cst_63 {dimension_numbers = #tpu.dot_dimension_numbers<[1], [0], [0], [1], [0, 0, 1, 1], [], []>} : vector<8x8xbf16>, vector<8x96xbf16>, vector<8x96xf32> -> vector<8x96xf32>
    %221 = arith.mulf %206, %220 : vector<8x96xf32>
    %222 = arith.truncf %221 : vector<8x96xf32> to vector<8x96xbf16>
    %c0_64 = arith.constant 0 : index
    %c0_65 = arith.constant 0 : index
    %223 = vector.load %arg11[%c0_64, %c0_65] : memref<96x12xbf16, #tpu.memory_space<vmem>>, vector<96x12xbf16>
    %cst_66 = arith.constant dense<0.000000e+00> : vector<8x12xf32>
    %224 = tpu.matmul %222, %223, %cst_66 {dimension_numbers = #tpu.dot_dimension_numbers<[1], [0], [0], [1], [0, 0, 1, 1], [], []>} : vector<8x96xbf16>, vector<96x12xbf16>, vector<8x12xf32> -> vector<8x12xf32>
    %cst_67 = arith.constant 0.000000e+00 : f32
    %225 = vector.broadcast %cst_67 : f32 to vector<8x108xf32>
    %226 = tpu.concatenate %217, %224, %225 in 1 : vector<8x8xf32>, vector<8x12xf32>, vector<8x108xf32> -> vector<8x128xf32>
    %c0_68 = arith.constant 0 : index
    %c0_69 = arith.constant 0 : index
    %227 = vector.load %arg13[%c0_68, %c0_69] : memref<8x128xf32, #tpu.memory_space<vmem>>, vector<8x128xf32>
    tpu.vector_store %arg13[%c0_68, %c0_69], %226 {strides = array<i32>} : memref<8x128xf32, #tpu.memory_space<vmem>>, vector<8x128xf32>,
    return
  }
}

</mosaic_0001>

<bundles_post_ra>
// kernel: _tpr_decoder_forward_impl.1
= control target key start
LH: loop header
LB: loop body
LE: loop exit
PB: predicated region body
PF: predicated region fallthrough
CT: control target
= control target key end

     0   :  { %v3028_v1 = vmov 0   ;;  %v2183_v51 = vmov 1983009808   ;;  %v364_v53 = vlaneseq  ;;  %vm532_vm0 = vcmask 1041408   ;;  %s2186_s15 = smov 64   ;;  %s2188_s24 = smov 8   ;;  %s3014_s3 = inlined_call_operand.vmem [shape: bf16[128,512], index: 3, kind: input, shape index: {}]   ;;  %s3015_s1 = inlined_call_operand.vmem [shape: f32[2,128], index: 1, kind: input, shape index: {}]   ;;  %s3016_s4 = inlined_call_operand.vmem [shape: bf16[128,256], index: 4, kind: input, shape index: {}]   ;;  %s3017_s0 = inlined_call_operand.vmem [shape: f32[4,2,512], index: 0, kind: input, shape index: {}]   ;;  %s3018_s2 = inlined_call_operand.vmem [shape: f32[2,128], index: 2, kind: input, shape index: {}]   ;;  %s3019_s5 = inlined_call_operand.vmem [shape: f32[2,128], index: 5, kind: input, shape index: {}]   ;;  %s3020_s6 = inlined_call_operand.vmem [shape: bf16[128,128], index: 6, kind: input, shape index: {}]   ;;  %s3021_s7 = inlined_call_operand.vmem [shape: bf16[128,96], index: 7, kind: input, shape index: {}]   ;;  %s3022_s12 = inlined_call_operand.vmem [shape: f32[8,128], index: 12, kind: output, shape index: {0}]   ;;  %s3023_s8 = inlined_call_operand.vmem [shape: bf16[32,8], index: 8, kind: input, shape index: {}]   ;;  %s3024_s10 = inlined_call_operand.vmem [shape: bf16[8,96], index: 10, kind: input, shape index: {}]   ;;  %s3025_s11 = inlined_call_operand.vmem [shape: bf16[96,12], index: 11, kind: input, shape index: {}]   ;;  %s3026_s9 = inlined_call_operand.vmem [shape: f32[1,8], index: 9, kind: input, shape index: {}]   ;;  %s3027_s13 = inlined_call_operand.vmem [shape: f32[8,128], index: 13, kind: output, shape index: {1}]  }
   0x1   :  { %v2262_v0 = vld [vmem:[%s3014_s3 + $0x4] ss:$16 sps:$4 sm:$0xff]   ;;  %305 = vmatprep.mubr.bf16.mxu0 %v3028_v1  ;;  %346 = vmatprep.mubr.bf16.mxu1 %v3028_v1  ;;  %v2269_v2 = vld [vmem:[%s3014_s3 + $0xc] ss:$16 sps:$4 sm:$0xff]   ;;  %v2275_v3 = vld [vmem:[%s3014_s3] ss:$16 sps:$4 sm:$0xff]   ;;  %v362_v52 = vunpack.c.l.s4 %v2183_v51 }
   0x2   :  { %3058 = vst [vmem:[#allocation2_spill] sm:$0xff] %v2262_v0  ;;  %3059 = vst [vmem:[#allocation3_spill] sm:$0xff] %v2269_v2  ;;  %273 = vmatprep.subr.bf16.mxu0 %v2262_v0  ;;  %v2280_v4 = vld [vmem:[%s3014_s3 + $0x8] ss:$16 sps:$4 sm:$0xff]   ;;  %314 = vmatprep.subr.bf16.mxu1 %v2269_v2  ;;  %v2286_v5 = vld [vmem:[%s3014_s3 + $0x24] ss:$16 sps:$4 sm:$0xff]  }
   0x3   :  { %274 = vmatpush1.bf16.msra.mxu0 %v2275_v3  ;;  %315 = vmatpush1.bf16.msra.mxu1 %v2280_v4  ;;  %v2293_v6 = vld [vmem:[%s3014_s3 + $0x2c] ss:$16 sps:$4 sm:$0xff]   ;;  %v2298_v7 = vld [vmem:[%s3014_s3 + $0x20] ss:$16 sps:$4 sm:$0xff]   ;;  %v2304_v8 = vld [vmem:[%s3014_s3 + $0x28] ss:$16 sps:$4 sm:$0xff]   ;;  %v363_v54 = vunpack.c.0.s8 %v362_v52 }
   0x4   :  { %275 = vmatprep.subr.bf16.mxu0 %v2286_v5  ;;  %316 = vmatprep.subr.bf16.mxu1 %v2293_v6  ;;  %v2310_v9 = vld [vmem:[%s3014_s3 + $0x44] ss:$16 sps:$4 sm:$0xff]   ;;  %v2315_v10 = vld [vmem:[%s3014_s3 + $0x4c] ss:$16 sps:$4 sm:$0xff]   ;;  %v2320_v11 = vld [vmem:[%s3014_s3 + $0x40] ss:$16 sps:$4 sm:$0xff]  }
   0x5   :  { %v2325_v12 = vld [vmem:[%s3014_s3 + $0x48] ss:$16 sps:$4 sm:$0xff]   ;;  %v2332_v13 = vld [vmem:[%s3014_s3 + $0x64] ss:$16 sps:$4 sm:$0xff]   ;;  %v2339_v14 = vld [vmem:[%s3014_s3 + $0x6c] ss:$16 sps:$4 sm:$0xff]  }
   0x6   :  { %v2344_v15 = vld [vmem:[%s3014_s3 + $0x60] ss:$16 sps:$4 sm:$0xff]   ;;  %v2351_v16 = vld [vmem:[%s3014_s3 + $0x68] ss:$16 sps:$4 sm:$0xff]   ;;  %v2356_v17 = vld [vmem:[%s3014_s3 + $0x84] ss:$16 sps:$4 sm:$0xff]  }
   0x7   :  { %276 = vmatpush1.bf16.msra.mxu0 %v2298_v7  ;;  %317 = vmatpush1.bf16.msra.mxu1 %v2304_v8  ;;  %v2363_v18 = vld [vmem:[%s3014_s3 + $0x8c] ss:$16 sps:$4 sm:$0xff]   ;;  %v2368_v19 = vld [vmem:[%s3014_s3 + $0x80] ss:$16 sps:$4 sm:$0xff]   ;;  %v2373_v20 = vld [vmem:[%s3014_s3 + $0x88] ss:$16 sps:$4 sm:$0xff]  }
   0x8   :  { %277 = vmatprep.subr.bf16.mxu0 %v2310_v9  ;;  %318 = vmatprep.subr.bf16.mxu1 %v2315_v10  ;;  %v2380_v21 = vld [vmem:[%s3014_s3 + $0xa4] ss:$16 sps:$4 sm:$0xff]   ;;  %v2387_v22 = vld [vmem:[%s3014_s3 + $0xac] ss:$16 sps:$4 sm:$0xff]   ;;  %v2394_v23 = vld [vmem:[%s3014_s3 + $0xa0] ss:$16 sps:$4 sm:$0xff]  }
   0x9   :  { %3060 = vst [vmem:[#allocation4_spill] sm:$0xff] %v2387_v22  ;;  %v2399_v24 = vld [vmem:[%s3014_s3 + $0xa8] ss:$16 sps:$4 sm:$0xff]   ;;  %v2406_v25 = vld [vmem:[%s3014_s3 + $0xc4] ss:$16 sps:$4 sm:$0xff]   ;;  %v365_v55 = vshrl.u32 %v364_v53, 7 }
   0xa   :  { %v2411_v26 = vld [vmem:[%s3014_s3 + $0xcc] ss:$16 sps:$4 sm:$0xff]   ;;  %v2418_v27 = vld [vmem:[%s3014_s3 + $0xc0] ss:$16 sps:$4 sm:$0xff]   ;;  %v2423_v28 = vld [vmem:[%s3014_s3 + $0xc8] ss:$16 sps:$4 sm:$0xff]  }
   0xb   :  { %278 = vmatpush1.bf16.msra.mxu0 %v2320_v11  ;;  %319 = vmatpush1.bf16.msra.mxu1 %v2325_v12  ;;  %3061 = vst [vmem:[#allocation5_spill] sm:$0xff] %v2411_v26  ;;  %v2430_v29 = vld [vmem:[%s3014_s3 + $0xe4] ss:$16 sps:$4 sm:$0xff]   ;;  %v2435_v30 = vld [vmem:[%s3014_s3 + $0xec] ss:$16 sps:$4 sm:$0xff]   ;;  %v2554_v58 = vsub.s32 %v363_v54, %v365_v55  ;;  %vm2185_vm1 = vmmov 0  }
   0xc   :  { %279 = vmatprep.subr.bf16.mxu0 %v2332_v13  ;;  %320 = vmatprep.subr.bf16.mxu1 %v2339_v14  ;;  %v2442_v31 = vld [vmem:[%s3014_s3 + $0xe0] ss:$16 sps:$4 sm:$0xff]   ;;  %v2447_v32 = vld [vmem:[%s3014_s3 + $0xe8] ss:$16 sps:$4 sm:$0xff]   ;;  %v2460_v35 = vld [vmem:[%s3016_s4 + $0x4] ss:$8 sps:$4 sm:$0xff]  }
   0xd   :  { %v109_v33 = vld [vmem:[%s3015_s1] sm:$0x3]  ;;  %v2472_v37 = vld [vmem:[%s3016_s4 + $0x14] ss:$8 sps:$4 sm:$0xff]   ;;  %v2477_v38 = vld [vmem:[%s3016_s4 + $0x10] ss:$8 sps:$4 sm:$0xff]  }
   0xe   :  { %v112_v34 = vpack.c.bf16 %v109_v33, %v109_v33  ;;  %v2465_v36 = vld [vmem:[%s3016_s4] ss:$8 sps:$4 sm:$0xff]   ;;  %v2482_v39 = vld [vmem:[%s3016_s4 + $0x24] ss:$8 sps:$4 sm:$0xff]   ;;  %v2495_v41 = vld [vmem:[%s3016_s4 + $0x34] ss:$8 sps:$4 sm:$0xff]  }
   0xf   :  { %280 = vmatpush1.bf16.msra.mxu0 %v2344_v15  ;;  %321 = vmatpush1.bf16.msra.mxu1 %v2351_v16  ;;  %v2489_v40 = vld [vmem:[%s3016_s4 + $0x20] ss:$8 sps:$4 sm:$0xff]   ;;  %v2501_v42 = vld [vmem:[%s3016_s4 + $0x30] ss:$8 sps:$4 sm:$0xff]   ;;  %v2507_v43 = vld [vmem:[%s3016_s4 + $0x44] ss:$8 sps:$4 sm:$0xff]  }
  0x10   :  { %281 = vmatprep.subr.bf16.mxu0 %v2356_v17  ;;  %322 = vmatprep.subr.bf16.mxu1 %v2363_v18  ;;  %v2513_v44 = vld [vmem:[%s3016_s4 + $0x40] ss:$8 sps:$4 sm:$0xff]   ;;  %v2519_v45 = vld [vmem:[%s3016_s4 + $0x54] ss:$8 sps:$4 sm:$0xff]   ;;  %v2525_v46 = vld [vmem:[%s3016_s4 + $0x50] ss:$8 sps:$4 sm:$0xff]  }
  0x11   :  { %3062 = vst [vmem:[#allocation6_spill] sm:$0xff] %v2519_v45  ;;  %3063 = vst [vmem:[#allocation7_spill] sm:$0xff] %v2525_v46  ;;  %v2531_v47 = vld [vmem:[%s3016_s4 + $0x64] ss:$8 sps:$4 sm:$0xff]   ;;  %v2537_v48 = vld [vmem:[%s3016_s4 + $0x60] ss:$8 sps:$4 sm:$0xff]  }
  0x12   :  { %3064 = vst [vmem:[#allocation8_spill] sm:$0xff] %v2531_v47  ;;  %3065 = vst [vmem:[#allocation9_spill] sm:$0xff] %v2537_v48  ;;  %v2543_v49 = vld [vmem:[%s3016_s4 + $0x74] ss:$8 sps:$4 sm:$0xff]   ;;  %v2549_v50 = vld [vmem:[%s3016_s4 + $0x70] ss:$8 sps:$4 sm:$0xff]  }
  0x13   :  { %282 = vmatpush1.bf16.msra.mxu0 %v2368_v19  ;;  %323 = vmatpush1.bf16.msra.mxu1 %v2373_v20  ;;  %3066 = vst [vmem:[#allocation10_spill] sm:$0xff] %v2543_v49  ;;  %3067 = vst [vmem:[#allocation11_spill] sm:$0xff] %v2549_v50  ;;  %v111_v51 = vld [vmem:[%s3017_s0] sm:$0xff]  ;;  %vm1349_vm2 = vcmask 1043456   ;;  %vm1351_vm3 = vcmask 1045504   ;;  %vm1492_vm4 = vcmask 261120  }
  0x14   :  { %283 = vmatprep.subr.bf16.mxu0 %v2380_v21  ;;  %324 = vmatprep.subr.bf16.mxu1 %v2387_v22  ;;  %vm1538_vm5 = vcmask 64512   ;;  %vm1635_vm6 = vcmask 785408   ;;  %vm1684_vm7 = vcmask 162816  }
  0x17   :  { %284 = vmatpush1.bf16.msra.mxu0 %v2394_v23  ;;  %325 = vmatpush1.bf16.msra.mxu1 %v2399_v24 }
  0x18   :  { %285 = vmatprep.subr.bf16.mxu0 %v2406_v25  ;;  %326 = vmatprep.subr.bf16.mxu1 %v2411_v26 }
  0x1b   :  { %286 = vmatpush1.bf16.msra.mxu0 %v2418_v27  ;;  %327 = vmatpush1.bf16.msra.mxu1 %v2423_v28 }
  0x1c   :  { %287 = vmatprep.subr.bf16.mxu0 %v2430_v29  ;;  %328 = vmatprep.subr.bf16.mxu1 %v2435_v30 }
  0x1f   :  { %288 = vmatpush1.bf16.msra.mxu0 %v2442_v31  ;;  %329 = vmatpush1.bf16.msra.mxu1 %v2447_v32 }
  0x20   :  { %490 = vmatprep.subr.bf16.mxu0 %v2460_v35 }
  0x22   :  { %306 = vmatmul.mubr.bf16.vlgmr.msra.gmra.mrb[0].mxu0 %v112_v34  ;;  %347 = vmatmul.mubr.bf16.vlgmr.msra.gmra.mrb[0].mxu1 %v112_v34 }
  0x23   :  { %522 = vmatprep.mubr.bf16.mxu0 %v3028_v1  ;;  %491 = vmatpush1.bf16.msra.mxu0 %v2465_v36 }
  0x24   :  { %492 = vmatprep.subr.bf16.mxu0 %v2472_v37 }
  0x27   :  { %493 = vmatpush1.bf16.msra.mxu0 %v2477_v38 }
  0x28   :  { %494 = vmatprep.subr.bf16.mxu0 %v2482_v39 }
  0x2b   :  { %495 = vmatpush1.bf16.msra.mxu0 %v2489_v40 }
  0x2c   :  { %496 = vmatprep.subr.bf16.mxu0 %v2495_v41 }
  0x2f   :  { %497 = vmatpush1.bf16.msra.mxu0 %v2501_v42 }
  0x30   :  { %498 = vmatprep.subr.bf16.mxu0 %v2507_v43 }
  0x33   :  { %499 = vmatpush1.bf16.msra.mxu0 %v2513_v44 }
  0x34   :  { %500 = vmatprep.subr.bf16.mxu0 %v2519_v45 }
  0x37   :  { %501 = vmatpush1.bf16.msra.mxu0 %v2525_v46 }
  0x38   :  { %502 = vmatprep.subr.bf16.mxu0 %v2531_v47 }
  0x3b   :  { %503 = vmatpush1.bf16.msra.mxu0 %v2537_v48 }
  0x3c   :  { %504 = vmatprep.subr.bf16.mxu0 %v2543_v49 }
  0x3f   :  { %505 = vmatpush1.bf16.msra.mxu0 %v2549_v50 }
  0x40   :  { %637 = vmatprep.subr.bf16.mxu0 %v2262_v0 }
  0xf5   :  { %v307_v56 = vpop.f32.mrb[0].mxu0  ;;  %v348_v57 = vpop.f32.mrb[0].mxu1 }
  0xf6   :  { %v309_v59 = vpop.f32.mrb[1].mxu0  ;;  %v350_v60 = vpop.f32.mrb[1].mxu1 }
  0xf7   :  { %v359_v61 = vcombine.low %v307_v56, %v309_v59  ;;  %v360_v62 = vcombine.low %v348_v57, %v350_v60  ;;  %v311_v63 = vpop.f32.mrb[2].mxu0  ;;  %v352_v33 = vpop.f32.mrb[2].mxu1 }
  0xf8   :  { %v312_v34 = vpop.f32.mrb[3].mxu0  ;;  %v353_v1 = vpop.f32.mrb[3].mxu1 }
  0xf9   :  { %v367_v50 = vrot.slane %v359_v61, %v2554_v58  ;;  %v374_v0 = vrot.slane %v360_v62, %v2554_v58 }
  0xfb   :  { %v375_v52 = vcombine.low %v367_v50, %v374_v0  ;;  %v110_v0 = vld [vmem:[%s3018_s2] sm:$0x3] }
  0xfd   :  { %v377_v53 = vadd.f32 %v375_v52, %v111_v51 }
  0xff   :  { %v1727_v54 = vmul.f32 -1.442695, %v377_v53  ;;  %v385_v55 = vrot.slane %v377_v53, 2  ;;  %v396_v56 = vrot.slane %v377_v53, 6  ;;  %v393_v60 = vrot.slane %v377_v53, 4 }
 0x101   :  { %2076 = vpow2.f32 %v1727_v54  ;;  %v1728_v49 = vmul.f32 -1.442695, %v385_v55  ;;  %v1729_v57 = vmul.f32 -1.442695, %v396_v56 }
 0x103   :  { %2078 = vpow2.f32 %v1728_v49 }
 0x104   :  { %2080 = vpow2.f32 %v1729_v57 }
 0x10b   :  { %v2077_v59 = vpop.eup %2076 }
 0x10c   :  { %v381_v1 = vadd.f32 1.0, %v2077_v59  ;;  %v3068_v59 = vmov 0  }
 0x10d   :  { %v2079_v63 = vpop.eup %2078 }
 0x10e   :  { %2082 = vrcp.f32 %v381_v1  ;;  %v390_v61 = vadd.f32 1.0, %v2079_v63  ;;  %v2081_v62 = vpop.eup %2080 }
 0x10f   :  { %2084 = vtanh.f32 %v393_v60  ;;  %v401_v49 = vadd.f32 1.0, %v2081_v62  ;;  %v2587_v60 = vld [vmem:[%s3019_s5] sm:$0x3] }
 0x110   :  { %2086 = vrcp.f32 %v390_v61 }
 0x111   :  { %2088 = vrcp.f32 %v401_v49  ;;  %v2603_v49 = vld [vmem:[%s3020_s6 + $0x8] sm:$0xff]  }
 0x118   :  { %v2083_v33 = vpop.eup %2082 }
 0x119   :  { %v2085_v50 = vpop.eup %2084 }
 0x11a   :  { %v2087_v34 = vpop.eup %2086  ;;  %v405_v52 = vmul.f32 %v2085_v50, %v2083_v33  ;;  %v3047_v50 = vmov 0.0  }
 0x11b   :  { %v404_v51 = vmul.f32 %v2087_v34, %v110_v0  ;;  %v2089_v53 = vpop.eup %2088  ;;  %1843 = vmatprep.subr.bf16.mxu1 %v3047_v50  ;;  %v2597_v34 = vld [vmem:[%s3020_s6] sm:$0xff]   ;;  %1859 = vmatprep.mubr.msk.bf16.mxu1 %vm2185_vm1, %v3047_v50 }
 0x11c   :  { %1844 = vmatpush3.bf16.msra.mxu1 %v2597_v34 }
 0x11d   :  { %v2564_v54 = vadd.f32 %v405_v52, %v404_v51  ;;  %1845 = vmatprep.subr.bf16.mxu1 %v3047_v50  ;;  %v2610_v51 = vld [vmem:[%s3020_s6 + $0x10] sm:$0xff]   ;;  %v2617_v52 = vld [vmem:[%s3020_s6 + $0x18] sm:$0xff]  }
 0x11f   :  { %2090 = vtanh.f32 %v2564_v54 }
 0x120   :  { %1846 = vmatpush3.bf16.msra.mxu1 %v2603_v49 }
 0x121   :  { %1847 = vmatprep.subr.bf16.mxu1 %v3047_v50 }
 0x124   :  { %1848 = vmatpush3.bf16.msra.mxu1 %v2610_v51 }
 0x125   :  { %1849 = vmatprep.subr.bf16.mxu1 %v3047_v50 }
 0x128   :  { %1850 = vmatpush3.bf16.msra.mxu1 %v2617_v52 }
 0x129   :  { %v2091_v55 = vpop.eup %2090  ;;  %1851 = vmatprep.subr.bf16.mxu1 %v3047_v50 }
 0x12a   :  { %v408_v56 = vmul.f32 %v2091_v55, %v2089_v53 }
 0x12c   :  { %v409_v57 = vpack.c.bf16 %v408_v56, %v408_v56 }
 0x12e   :  { %523 = vmatmul.mubr.bf16.vlgmr.msra.gmra.mrb[4].mxu0 %v409_v57 }
 0x12f   :  { %638 = vmatpush1.bf16.msra.mxu0 %v2275_v3  ;;  %669 = vmatprep.mubr.bf16.mxu0 %v3068_v59 }
 0x130   :  { %639 = vmatprep.subr.bf16.mxu0 %v2286_v5 }
 0x133   :  { %640 = vmatpush1.bf16.msra.mxu0 %v2298_v7 }
 0x134   :  { %641 = vmatprep.subr.bf16.mxu0 %v2310_v9 }
 0x137   :  { %642 = vmatpush1.bf16.msra.mxu0 %v2320_v11 }
 0x138   :  { %643 = vmatprep.subr.bf16.mxu0 %v2332_v13 }
 0x13b   :  { %644 = vmatpush1.bf16.msra.mxu0 %v2344_v15 }
 0x13c   :  { %645 = vmatprep.subr.bf16.mxu0 %v2356_v17 }
 0x13f   :  { %646 = vmatpush1.bf16.msra.mxu0 %v2368_v19 }
 0x140   :  { %647 = vmatprep.subr.bf16.mxu0 %v2380_v21 }
 0x143   :  { %648 = vmatpush1.bf16.msra.mxu0 %v2394_v23 }
 0x144   :  { %649 = vmatprep.subr.bf16.mxu0 %v2406_v25 }
 0x147   :  { %650 = vmatpush1.bf16.msra.mxu0 %v2418_v27 }
 0x148   :  { %651 = vmatprep.subr.bf16.mxu0 %v2430_v29 }
 0x14b   :  { %652 = vmatpush1.bf16.msra.mxu0 %v2442_v31 }
 0x14c   :  { %774 = vmatprep.subr.bf16.mxu0 %v2460_v35 }
 0x201   :  { %v524_v1 = vpop.f32.mrb[4].mxu0 }
 0x202   :  { %v531_v63 = vadd.f32 %v524_v1, %v2587_v60  ;;  %v2590_v61 = vpop.f32.mrb[5].mxu0 }
 0x203   :  { %v528_v62 = vpop.f32.mrb[6].mxu0 }
 0x204   :  { %v529_v33 = vpop.f32.mrb[7].mxu0  ;;  %v533_v0 = vsel %vm532_vm0, %v531_v63, -inf  ;;  %v2626_v62 = vld [vmem:[%s3020_s6 + $0x20] sm:$0xff]  }
 0x205   :  { %534 = vmax.xlane.f32.xlu0 %v533_v0  ;;  %3069 = vst [vmem:[#allocation12_spill] sm:$0xff] %v2626_v62  ;;  %1852 = vmatpush3.bf16.msra.mxu1 %v2626_v62  ;;  %v2632_v33 = vld [vmem:[%s3020_s6 + $0x28] sm:$0xff]   ;;  %v2648_v0 = vld [vmem:[%s3020_s6 + $0x38] sm:$0xff]  }
 0x206   :  { %3070 = vst [vmem:[#allocation13_spill] sm:$0xff] %v2632_v33  ;;  %1853 = vmatprep.subr.bf16.mxu1 %v3047_v50  ;;  %3072 = vst [vmem:[#allocation15_spill] sm:$0xff] %v2648_v0 }
 0x209   :  { %1854 = vmatpush3.bf16.msra.mxu1 %v2632_v33 }
 0x20a   :  { %1855 = vmatprep.subr.bf16.mxu1 %v3047_v50 }
 0x292   :  { %v535_v53 = vpop.xlane.xlu0 %534 }
 0x293   :  { %v536_v55 = vsub.f32 %v531_v63, %v535_v53  ;;  %v2641_v63 = vld [vmem:[%s3020_s6 + $0x30] sm:$0xff]  }
 0x294   :  { %3071 = vst [vmem:[#allocation14_spill] sm:$0xff] %v2641_v63  ;;  %1856 = vmatpush3.bf16.msra.mxu1 %v2641_v63 }
 0x295   :  { %v537_v56 = vmul.f32 1.442695, %v536_v55  ;;  %1857 = vmatprep.subr.bf16.mxu1 %v3047_v50 }
 0x297   :  { %2092 = vpow2.f32 %v537_v56 }
 0x298   :  { %1858 = vmatpush3.bf16.msra.mxu1 %v2648_v0 }
 0x299   :  { %678 = vmatprep.subr.bf16.mxu1 %v2269_v2 }
 0x2a1   :  { %v2093_v57 = vpop.eup %2092 }
 0x2a2   :  { %v539_v1 = vsel %vm532_vm0, %v2093_v57, 0.0 }
 0x2a3   :  { %540 = vadd.xlane.f32.xlu0 %v539_v1 }
 0x330   :  { %v541_v53 = vpop.xlane.xlu0 %540 }
 0x331   :  { %2094 = vrcp.f32 %v541_v53 }
 0x33b   :  { %v2095_v55 = vpop.eup %2094 }
 0x33c   :  { %v543_v56 = vmul.f32 %v2095_v55, %v2093_v57 }
 0x33e   :  { %v544_v1 = vpack.c.bf16 %v543_v56, %v543_v56 }
 0x340   :  { %1860 = vmatmul.mubr.bf16.vlgmr.msra.gmra.mrb[4].mxu1 %v544_v1 }
 0x341   :  { %679 = vmatpush1.bf16.msra.mxu1 %v2280_v4  ;;  %710 = vmatprep.mubr.bf16.mxu1 %v3068_v59 }
 0x342   :  { %680 = vmatprep.subr.bf16.mxu1 %v2293_v6 }
 0x345   :  { %681 = vmatpush1.bf16.msra.mxu1 %v2304_v8 }
 0x346   :  { %682 = vmatprep.subr.bf16.mxu1 %v2315_v10 }
 0x349   :  { %683 = vmatpush1.bf16.msra.mxu1 %v2325_v12 }
 0x34a   :  { %684 = vmatprep.subr.bf16.mxu1 %v2339_v14 }
 0x34d   :  { %685 = vmatpush1.bf16.msra.mxu1 %v2351_v16 }
 0x34e   :  { %686 = vmatprep.subr.bf16.mxu1 %v2363_v18 }
 0x351   :  { %687 = vmatpush1.bf16.msra.mxu1 %v2373_v20 }
 0x352   :  { %688 = vmatprep.subr.bf16.mxu1 %v2387_v22 }
 0x355   :  { %689 = vmatpush1.bf16.msra.mxu1 %v2399_v24 }
 0x356   :  { %690 = vmatprep.subr.bf16.mxu1 %v2411_v26 }
 0x359   :  { %691 = vmatpush1.bf16.msra.mxu1 %v2423_v28 }
 0x35a   :  { %692 = vmatprep.subr.bf16.mxu1 %v2435_v30 }
 0x35d   :  { %693 = vmatpush1.bf16.msra.mxu1 %v2447_v32 }
 0x35e   :  { %1863 = vmatprep.subr.bf16.mxu1 %v3047_v50 }
 0x413   :  { %v627_v57 = vpop.f32.mrb[4].mxu1 }
 0x414   :  { %v628_v53 = vadd.f32 %v627_v57, %v2590_v61  ;;  %v1861_v55 = vpop.f32.mrb[5].mxu1  ;;  %v3075_v61 = vld [vmem:[#allocation11_spill] sm:$0xff]  ;;  %v3076_v57 = vld [vmem:[#allocation2_spill] sm:$0xff] }
 0x415   :  { %v630_v56 = vpop.f32.mrb[6].mxu1 }
 0x416   :  { %2096 = vtanh.f32 %v628_v53  ;;  %v1862_v1 = vpop.f32.mrb[7].mxu1 }
 0x420   :  { %v2671_v22 = vpop.eup %2096 }
 0x421   :  { %3073 = vst [vmem:[#allocation16_spill] sm:$0xff] %v2671_v22  ;;  %v636_v26 = vpack.c.bf16 %v2671_v22, %v2671_v22 }
 0x423   :  { %670 = vmatmul.mubr.bf16.vlgmr.msra.gmra.mrb[8].mxu0 %v636_v26  ;;  %711 = vmatmul.mubr.bf16.vlgmr.msra.gmra.mrb[8].mxu1 %v636_v26  ;;  %v3074_v26 = vld [vmem:[#allocation10_spill] sm:$0xff] }
 0x424   :  { %775 = vmatpush1.bf16.msra.mxu0 %v2465_v36  ;;  %806 = vmatprep.mubr.bf16.mxu0 %v3068_v59 }
 0x425   :  { %776 = vmatprep.subr.bf16.mxu0 %v2472_v37  ;;  %1864 = vmatpush3.bf16.msra.mxu1 %v2597_v34 }
 0x426   :  { %1865 = vmatprep.subr.bf16.mxu1 %v3047_v50  ;;  %1879 = vmatprep.mubr.msk.bf16.mxu1 %vm2185_vm1, %v3047_v50 }
 0x428   :  { %777 = vmatpush1.bf16.msra.mxu0 %v2477_v38 }
 0x429   :  { %778 = vmatprep.subr.bf16.mxu0 %v2482_v39  ;;  %1866 = vmatpush3.bf16.msra.mxu1 %v2603_v49 }
 0x42a   :  { %1867 = vmatprep.subr.bf16.mxu1 %v3047_v50 }
 0x42c   :  { %779 = vmatpush1.bf16.msra.mxu0 %v2489_v40 }
 0x42d   :  { %780 = vmatprep.subr.bf16.mxu0 %v2495_v41  ;;  %1868 = vmatpush3.bf16.msra.mxu1 %v2610_v51 }
 0x42e   :  { %1869 = vmatprep.subr.bf16.mxu1 %v3047_v50 }
 0x430   :  { %781 = vmatpush1.bf16.msra.mxu0 %v2501_v42 }
 0x431   :  { %782 = vmatprep.subr.bf16.mxu0 %v2507_v43  ;;  %1870 = vmatpush3.bf16.msra.mxu1 %v2617_v52 }
 0x432   :  { %1871 = vmatprep.subr.bf16.mxu1 %v3047_v50 }
 0x434   :  { %783 = vmatpush1.bf16.msra.mxu0 %v2513_v44 }
 0x435   :  { %784 = vmatprep.subr.bf16.mxu0 %v2519_v45  ;;  %1872 = vmatpush3.bf16.msra.mxu1 %v2626_v62 }
 0x436   :  { %1873 = vmatprep.subr.bf16.mxu1 %v3047_v50 }
 0x438   :  { %785 = vmatpush1.bf16.msra.mxu0 %v2525_v46 }
 0x439   :  { %786 = vmatprep.subr.bf16.mxu0 %v2531_v47  ;;  %1874 = vmatpush3.bf16.msra.mxu1 %v2632_v33 }
 0x43a   :  { %1875 = vmatprep.subr.bf16.mxu1 %v3047_v50 }
 0x43c   :  { %787 = vmatpush1.bf16.msra.mxu0 %v2537_v48 }
 0x43d   :  { %788 = vmatprep.subr.bf16.mxu0 %v3074_v26  ;;  %1876 = vmatpush3.bf16.msra.mxu1 %v2641_v63 }
 0x43e   :  { %1877 = vmatprep.subr.bf16.mxu1 %v3047_v50 }
 0x440   :  { %789 = vmatpush1.bf16.msra.mxu0 %v3075_v61 }
 0x441   :  { %1878 = vmatpush3.bf16.msra.mxu1 %v2648_v0  ;;  %872 = vmatprep.subr.bf16.mxu0 %v3076_v57  ;;  %v1754_v57 = vld [vmem:[%s3017_s0 + $0x8] sm:$0xff] }
 0x442   :  { %913 = vmatprep.subr.bf16.mxu1 %v2269_v2 }
 0x4f6   :  { %v671_v53 = vpop.f32.mrb[8].mxu0  ;;  %v712_v55 = vpop.f32.mrb[8].mxu1 }
 0x4f7   :  { %v673_v56 = vpop.f32.mrb[9].mxu0  ;;  %v714_v1 = vpop.f32.mrb[9].mxu1 }
 0x4f8   :  { %v723_v22 = vcombine.low %v671_v53, %v673_v56  ;;  %v724_v48 = vcombine.low %v712_v55, %v714_v1  ;;  %v675_v33 = vpop.f32.mrb[10].mxu0  ;;  %v716_v26 = vpop.f32.mrb[10].mxu1 }
 0x4f9   :  { %v676_v47 = vpop.f32.mrb[11].mxu0  ;;  %v717_v63 = vpop.f32.mrb[11].mxu1 }
 0x4fa   :  { %v731_v50 = vrot.slane %v723_v22, %v2554_v58  ;;  %v738_v61 = vrot.slane %v724_v48, %v2554_v58 }
 0x4fc   :  { %v739_v0 = vcombine.low %v731_v50, %v738_v61 }
 0x4fe   :  { %v741_v2 = vadd.f32 %v1754_v57, %v739_v0 }
 0x500   :  { %v1755_v46 = vmul.f32 -1.442695, %v741_v2  ;;  %v749_v62 = vrot.slane %v741_v2, 2  ;;  %v760_v53 = vrot.slane %v741_v2, 6  ;;  %v757_v47 = vrot.slane %v741_v2, 4 }
 0x502   :  { %2098 = vpow2.f32 %v1755_v46  ;;  %v1756_v45 = vmul.f32 -1.442695, %v749_v62  ;;  %v1757_v33 = vmul.f32 -1.442695, %v760_v53 }
 0x504   :  { %2100 = vpow2.f32 %v1756_v45 }
 0x505   :  { %2102 = vpow2.f32 %v1757_v33 }
 0x50c   :  { %v2099_v26 = vpop.eup %2098 }
 0x50d   :  { %v745_v63 = vadd.f32 1.0, %v2099_v26 }
 0x50e   :  { %v2101_v55 = vpop.eup %2100 }
 0x50f   :  { %2104 = vrcp.f32 %v745_v63  ;;  %v754_v22 = vadd.f32 1.0, %v2101_v55  ;;  %v2103_v48 = vpop.eup %2102 }
 0x510   :  { %2106 = vtanh.f32 %v757_v47  ;;  %v765_v61 = vadd.f32 1.0, %v2103_v48 }
 0x511   :  { %2108 = vrcp.f32 %v754_v22 }
 0x512   :  { %2110 = vrcp.f32 %v765_v61  ;;  %v3082_v61 = vld [vmem:[#allocation7_spill] sm:$0xff] }
 0x519   :  { %v2105_v56 = vpop.eup %2104 }
 0x51a   :  { %v2107_v50 = vpop.eup %2106 }
 0x51b   :  { %v2109_v0 = vpop.eup %2108  ;;  %v769_v62 = vmul.f32 %v2107_v50, %v2105_v56  ;;  %v3077_v50 = vld [vmem:[#allocation4_spill] sm:$0xff] }
 0x51c   :  { %v768_v46 = vmul.f32 %v2109_v0, %v2564_v54  ;;  %v2111_v2 = vpop.eup %2110  ;;  %v3081_v0 = vld [vmem:[#allocation12_spill] sm:$0xff] }
 0x51e   :  { %v2716_v45 = vadd.f32 %v769_v62, %v768_v46  ;;  %v3083_v46 = vld [vmem:[#allocation8_spill] sm:$0xff]  ;;  %v3084_v62 = vld [vmem:[#allocation13_spill] sm:$0xff] }
 0x520   :  { %2112 = vtanh.f32 %v2716_v45 }
 0x52a   :  { %v2113_v57 = vpop.eup %2112 }
 0x52b   :  { %v772_v1 = vmul.f32 %v2113_v57, %v2111_v2  ;;  %v3085_v2 = vld [vmem:[#allocation9_spill] sm:$0xff]  ;;  %v3086_v57 = vld [vmem:[#allocation10_spill] sm:$0xff] }
 0x52d   :  { %v773_v53 = vpack.c.bf16 %v772_v1, %v772_v1  ;;  %v3087_v1 = vld [vmem:[#allocation14_spill] sm:$0xff] }
 0x52f   :  { %807 = vmatmul.mubr.bf16.vlgmr.msra.gmra.mrb[12].mxu0 %v773_v53  ;;  %v3088_v53 = vld [vmem:[#allocation11_spill] sm:$0xff] }
 0x530   :  { %873 = vmatpush1.bf16.msra.mxu0 %v2275_v3  ;;  %904 = vmatprep.mubr.bf16.mxu0 %v3068_v59 }
 0x531   :  { %874 = vmatprep.subr.bf16.mxu0 %v2286_v5 }
 0x534   :  { %875 = vmatpush1.bf16.msra.mxu0 %v2298_v7 }
 0x535   :  { %876 = vmatprep.subr.bf16.mxu0 %v2310_v9 }
 0x538   :  { %877 = vmatpush1.bf16.msra.mxu0 %v2320_v11 }
 0x539   :  { %878 = vmatprep.subr.bf16.mxu0 %v2332_v13 }
 0x53c   :  { %879 = vmatpush1.bf16.msra.mxu0 %v2344_v15 }
 0x53d   :  { %880 = vmatprep.subr.bf16.mxu0 %v2356_v17 }
 0x540   :  { %881 = vmatpush1.bf16.msra.mxu0 %v2368_v19 }
 0x541   :  { %882 = vmatprep.subr.bf16.mxu0 %v2380_v21 }
 0x544   :  { %883 = vmatpush1.bf16.msra.mxu0 %v2394_v23 }
 0x545   :  { %884 = vmatprep.subr.bf16.mxu0 %v2406_v25 }
 0x548   :  { %885 = vmatpush1.bf16.msra.mxu0 %v2418_v27 }
 0x549   :  { %886 = vmatprep.subr.bf16.mxu0 %v2430_v29 }
 0x54c   :  { %887 = vmatpush1.bf16.msra.mxu0 %v2442_v31 }
 0x54d   :  { %1009 = vmatprep.subr.bf16.mxu0 %v2460_v35 }
 0x602   :  { %v808_v3 = vpop.f32.mrb[12].mxu0 }
 0x603   :  { %v815_v5 = vadd.f32 %v808_v3, %v2587_v60  ;;  %v810_v7 = vpop.f32.mrb[13].mxu0  ;;  %v3089_v3 = vld [vmem:[#allocation15_spill] sm:$0xff] }
 0x604   :  { %v812_v9 = vpop.f32.mrb[14].mxu0 }
 0x605   :  { %v813_v11 = vpop.f32.mrb[15].mxu0  ;;  %v816_v13 = vsel %vm532_vm0, %v815_v5, -inf }
 0x606   :  { %817 = vmax.xlane.f32.xlu1 %v816_v13 }
 0x693   :  { %v818_v54 = vpop.xlane.xlu1 %817 }
 0x694   :  { %v819_v33 = vsub.f32 %v815_v5, %v818_v54  ;;  %v3090_v5 = vld [vmem:[#allocation2_spill] sm:$0xff] }
 0x696   :  { %v820_v26 = vmul.f32 1.442695, %v819_v33 }
 0x698   :  { %2114 = vpow2.f32 %v820_v26 }
 0x6a2   :  { %v2115_v47 = vpop.eup %2114 }
 0x6a3   :  { %v822_v63 = vsel %vm532_vm0, %v2115_v47, 0.0 }
 0x6a4   :  { %823 = vadd.xlane.f32.xlu1 %v822_v63 }
 0x731   :  { %v824_v55 = vpop.xlane.xlu1 %823 }
 0x732   :  { %2116 = vrcp.f32 %v824_v55 }
 0x73c   :  { %v2117_v22 = vpop.eup %2116 }
 0x73d   :  { %v826_v48 = vmul.f32 %v2117_v22, %v2115_v47 }
 0x73f   :  { %v827_v56 = vpack.c.bf16 %v826_v48, %v826_v48 }
 0x741   :  { %1880 = vmatmul.mubr.bf16.vlgmr.msra.gmra.mrb[12].mxu1 %v827_v56 }
 0x742   :  { %914 = vmatpush1.bf16.msra.mxu1 %v2280_v4  ;;  %945 = vmatprep.mubr.bf16.mxu1 %v3068_v59  ;;  %v3078_v4 = vld [vmem:[#allocation5_spill] sm:$0xff] }
 0x743   :  { %915 = vmatprep.subr.bf16.mxu1 %v2293_v6  ;;  %v3079_v6 = vmov 0.0  }
 0x746   :  { %916 = vmatpush1.bf16.msra.mxu1 %v2304_v8 }
 0x747   :  { %917 = vmatprep.subr.bf16.mxu1 %v2315_v10 }
 0x74a   :  { %918 = vmatpush1.bf16.msra.mxu1 %v2325_v12 }
 0x74b   :  { %919 = vmatprep.subr.bf16.mxu1 %v2339_v14 }
 0x74e   :  { %920 = vmatpush1.bf16.msra.mxu1 %v2351_v16 }
 0x74f   :  { %921 = vmatprep.subr.bf16.mxu1 %v2363_v18 }
 0x752   :  { %922 = vmatpush1.bf16.msra.mxu1 %v2373_v20 }
 0x753   :  { %923 = vmatprep.subr.bf16.mxu1 %v3077_v50  ;;  %v1758_v50 = vld [vmem:[%s3017_s0 + $0x10] sm:$0xff] }
 0x756   :  { %924 = vmatpush1.bf16.msra.mxu1 %v2399_v24  ;;  %v3080_v24 = vld [vmem:[#allocation6_spill] sm:$0xff] }
 0x757   :  { %925 = vmatprep.subr.bf16.mxu1 %v3078_v4 }
 0x75a   :  { %926 = vmatpush1.bf16.msra.mxu1 %v2423_v28 }
 0x75b   :  { %927 = vmatprep.subr.bf16.mxu1 %v2435_v30 }
 0x75e   :  { %928 = vmatpush1.bf16.msra.mxu1 %v2447_v32 }
 0x75f   :  { %1883 = vmatprep.subr.bf16.mxu1 %v3079_v6 }
 0x814   :  { %v862_v8 = vpop.f32.mrb[12].mxu1 }
 0x815   :  { %v863_v10 = vadd.f32 %v862_v8, %v810_v7  ;;  %v1881_v12 = vpop.f32.mrb[13].mxu1  ;;  %v3091_v7 = vld [vmem:[#allocation3_spill] sm:$0xff] }
 0x816   :  { %v865_v14 = vpop.f32.mrb[14].mxu1 }
 0x817   :  { %2118 = vtanh.f32 %v863_v10  ;;  %v1882_v16 = vpop.f32.mrb[15].mxu1 }
 0x821   :  { %v2756_v18 = vpop.eup %2118 }
 0x822   :  { %v871_v20 = vpack.c.bf16 %v2756_v18, %v2756_v18 }
 0x824   :  { %905 = vmatmul.mubr.bf16.vlgmr.msra.gmra.mrb[16].mxu0 %v871_v20  ;;  %946 = vmatmul.mubr.bf16.vlgmr.msra.gmra.mrb[16].mxu1 %v871_v20 }
 0x825   :  { %1010 = vmatpush1.bf16.msra.mxu0 %v2465_v36  ;;  %1041 = vmatprep.mubr.bf16.mxu0 %v3068_v59 }
 0x826   :  { %1011 = vmatprep.subr.bf16.mxu0 %v2472_v37  ;;  %1884 = vmatpush3.bf16.msra.mxu1 %v2597_v34 }
 0x827   :  { %1885 = vmatprep.subr.bf16.mxu1 %v3079_v6  ;;  %1899 = vmatprep.mubr.msk.bf16.mxu1 %vm2185_vm1, %v3079_v6 }
 0x829   :  { %1012 = vmatpush1.bf16.msra.mxu0 %v2477_v38 }
 0x82a   :  { %1013 = vmatprep.subr.bf16.mxu0 %v2482_v39  ;;  %1886 = vmatpush3.bf16.msra.mxu1 %v2603_v49 }
 0x82b   :  { %1887 = vmatprep.subr.bf16.mxu1 %v3079_v6 }
 0x82d   :  { %1014 = vmatpush1.bf16.msra.mxu0 %v2489_v40 }
 0x82e   :  { %1015 = vmatprep.subr.bf16.mxu0 %v2495_v41  ;;  %1888 = vmatpush3.bf16.msra.mxu1 %v2610_v51 }
 0x82f   :  { %1889 = vmatprep.subr.bf16.mxu1 %v3079_v6 }
 0x831   :  { %1016 = vmatpush1.bf16.msra.mxu0 %v2501_v42 }
 0x832   :  { %1017 = vmatprep.subr.bf16.mxu0 %v2507_v43  ;;  %1890 = vmatpush3.bf16.msra.mxu1 %v2617_v52 }
 0x833   :  { %1891 = vmatprep.subr.bf16.mxu1 %v3079_v6 }
 0x835   :  { %1018 = vmatpush1.bf16.msra.mxu0 %v2513_v44 }
 0x836   :  { %1019 = vmatprep.subr.bf16.mxu0 %v3080_v24  ;;  %1892 = vmatpush3.bf16.msra.mxu1 %v3081_v0 }
 0x837   :  { %1893 = vmatprep.subr.bf16.mxu1 %v3079_v6 }
 0x839   :  { %1020 = vmatpush1.bf16.msra.mxu0 %v3082_v61 }
 0x83a   :  { %1021 = vmatprep.subr.bf16.mxu0 %v3083_v46  ;;  %1894 = vmatpush3.bf16.msra.mxu1 %v3084_v62 }
 0x83b   :  { %1895 = vmatprep.subr.bf16.mxu1 %v3079_v6 }
 0x83d   :  { %1022 = vmatpush1.bf16.msra.mxu0 %v3085_v2 }
 0x83e   :  { %1023 = vmatprep.subr.bf16.mxu0 %v3086_v57  ;;  %1896 = vmatpush3.bf16.msra.mxu1 %v3087_v1 }
 0x83f   :  { %1897 = vmatprep.subr.bf16.mxu1 %v3079_v6 }
 0x841   :  { %1024 = vmatpush1.bf16.msra.mxu0 %v3088_v53 }
 0x842   :  { %1898 = vmatpush3.bf16.msra.mxu1 %v3089_v3  ;;  %1107 = vmatprep.subr.bf16.mxu0 %v3090_v5 }
 0x843   :  { %1148 = vmatprep.subr.bf16.mxu1 %v3091_v7 }
 0x8f7   :  { %v906_v9 = vpop.f32.mrb[16].mxu0  ;;  %v947_v11 = vpop.f32.mrb[16].mxu1 }
 0x8f8   :  { %v908_v13 = vpop.f32.mrb[17].mxu0  ;;  %v949_v54 = vpop.f32.mrb[17].mxu1 }
 0x8f9   :  { %v958_v33 = vcombine.low %v906_v9, %v908_v13  ;;  %v959_v26 = vcombine.low %v947_v11, %v949_v54  ;;  %v910_v47 = vpop.f32.mrb[18].mxu0  ;;  %v951_v63 = vpop.f32.mrb[18].mxu1 }
 0x8fa   :  { %v911_v55 = vpop.f32.mrb[19].mxu0  ;;  %v952_v22 = vpop.f32.mrb[19].mxu1 }
 0x8fb   :  { %v966_v48 = vrot.slane %v958_v33, %v2554_v58  ;;  %v973_v56 = vrot.slane %v959_v26, %v2554_v58 }
 0x8fd   :  { %v974_v4 = vcombine.low %v966_v48, %v973_v56 }
 0x8ff   :  { %v976_v8 = vadd.f32 %v1758_v50, %v974_v4 }
 0x901   :  { %v1759_v10 = vmul.f32 -1.442695, %v976_v8  ;;  %v984_v12 = vrot.slane %v976_v8, 2  ;;  %v995_v16 = vrot.slane %v976_v8, 6  ;;  %v992_v7 = vrot.slane %v976_v8, 4 }
 0x903   :  { %2120 = vpow2.f32 %v1759_v10  ;;  %v1760_v14 = vmul.f32 -1.442695, %v984_v12  ;;  %v1761_v20 = vmul.f32 -1.442695, %v995_v16  ;;  %v2164_v10 = vld [vmem:[%s3014_s3] ss:$16 sps:$4 sm:$0xff]  }
 0x904   :  { %v2166_v12 = vld [vmem:[%s3014_s3 + $0x20] ss:$16 sps:$4 sm:$0xff]  }
 0x905   :  { %2122 = vpow2.f32 %v1760_v14  ;;  %v2167_v14 = vld [vmem:[%s3014_s3 + $0x44] ss:$16 sps:$4 sm:$0xff]   ;;  %v2168_v16 = vld [vmem:[%s3014_s3 + $0x40] ss:$16 sps:$4 sm:$0xff]  }
 0x906   :  { %2124 = vpow2.f32 %v1761_v20  ;;  %v2169_v20 = vld [vmem:[%s3014_s3 + $0x64] ss:$16 sps:$4 sm:$0xff]  }
 0x90d   :  { %v2121_v5 = vpop.eup %2120 }
 0x90e   :  { %v980_v9 = vadd.f32 1.0, %v2121_v5 }
 0x90f   :  { %v2123_v11 = vpop.eup %2122 }
 0x910   :  { %2126 = vrcp.f32 %v980_v9  ;;  %v989_v13 = vadd.f32 1.0, %v2123_v11  ;;  %v2125_v54 = vpop.eup %2124 }
 0x911   :  { %2128 = vtanh.f32 %v992_v7  ;;  %v1000_v63 = vadd.f32 1.0, %v2125_v54  ;;  %v2170_v54 = vld [vmem:[%s3014_s3 + $0x8] ss:$16 sps:$4 sm:$0xff]  }
 0x912   :  { %2130 = vrcp.f32 %v989_v13 }
 0x913   :  { %2132 = vrcp.f32 %v1000_v63  ;;  %v2174_v63 = vld [vmem:[%s3014_s3 + $0x48] ss:$16 sps:$4 sm:$0xff]  }
 0x91a   :  { %v2127_v33 = vpop.eup %2126 }
 0x91b   :  { %v2129_v26 = vpop.eup %2128 }
 0x91c   :  { %v2131_v47 = vpop.eup %2130  ;;  %v1004_v22 = vmul.f32 %v2129_v26, %v2127_v33  ;;  %v2171_v33 = vld [vmem:[%s3014_s3 + $0x2c] ss:$16 sps:$4 sm:$0xff]   ;;  %v2172_v26 = vld [vmem:[%s3014_s3 + $0x28] ss:$16 sps:$4 sm:$0xff]  }
 0x91d   :  { %v1003_v55 = vmul.f32 %v2131_v47, %v2716_v45  ;;  %v2133_v56 = vpop.eup %2132  ;;  %v2165_v45 = vld [vmem:[%s3014_s3 + $0x24] ss:$16 sps:$4 sm:$0xff]   ;;  %v2173_v47 = vld [vmem:[%s3014_s3 + $0x4c] ss:$16 sps:$4 sm:$0xff]  }
 0x91f   :  { %v2801_v48 = vadd.f32 %v1004_v22, %v1003_v55  ;;  %v2175_v55 = vld [vmem:[%s3014_s3 + $0x6c] ss:$16 sps:$4 sm:$0xff]   ;;  %v2176_v22 = vld [vmem:[%s3014_s3 + $0x68] ss:$16 sps:$4 sm:$0xff]  }
 0x921   :  { %2134 = vtanh.f32 %v2801_v48 }
 0x92b   :  { %v2135_v50 = vpop.eup %2134 }
 0x92c   :  { %v1007_v4 = vmul.f32 %v2135_v50, %v2133_v56  ;;  %v2177_v56 = vld [vmem:[%s3014_s3 + $0x8c] ss:$16 sps:$4 sm:$0xff]   ;;  %v2178_v50 = vld [vmem:[%s3014_s3 + $0x88] ss:$16 sps:$4 sm:$0xff]  }
 0x92e   :  { %v1008_v8 = vpack.c.bf16 %v1007_v4, %v1007_v4  ;;  %v2179_v4 = vld [vmem:[%s3014_s3 + $0xac] ss:$16 sps:$4 sm:$0xff]  }
 0x930   :  { %1042 = vmatmul.mubr.bf16.vlgmr.msra.gmra.mrb[20].mxu0 %v1008_v8  ;;  %v2180_v8 = vld [vmem:[%s3014_s3 + $0xa8] ss:$16 sps:$4 sm:$0xff]  }
 0x931   :  { %1108 = vmatpush1.bf16.msra.mxu0 %v2164_v10  ;;  %1139 = vmatprep.mubr.bf16.mxu0 %v3068_v59  ;;  %v2181_v10 = vld [vmem:[%s3014_s3 + $0xcc] ss:$16 sps:$4 sm:$0xff]  }
 0x932   :  { %1109 = vmatprep.subr.bf16.mxu0 %v2165_v45 }
 0x935   :  { %1110 = vmatpush1.bf16.msra.mxu0 %v2166_v12 }
 0x936   :  { %1111 = vmatprep.subr.bf16.mxu0 %v2167_v14 }
 0x939   :  { %1112 = vmatpush1.bf16.msra.mxu0 %v2168_v16 }
 0x93a   :  { %1113 = vmatprep.subr.bf16.mxu0 %v2169_v20 }
 0x93d   :  { %1114 = vmatpush1.bf16.msra.mxu0 %v2344_v15 }
 0x93e   :  { %1115 = vmatprep.subr.bf16.mxu0 %v2356_v17 }
 0x941   :  { %1116 = vmatpush1.bf16.msra.mxu0 %v2368_v19 }
 0x942   :  { %1117 = vmatprep.subr.bf16.mxu0 %v2380_v21 }
 0x945   :  { %1118 = vmatpush1.bf16.msra.mxu0 %v2394_v23 }
 0x946   :  { %1119 = vmatprep.subr.bf16.mxu0 %v2406_v25 }
 0x949   :  { %1120 = vmatpush1.bf16.msra.mxu0 %v2418_v27 }
 0x94a   :  { %1121 = vmatprep.subr.bf16.mxu0 %v2430_v29 }
 0x94d   :  { %1122 = vmatpush1.bf16.msra.mxu0 %v2442_v31 }
 0x94e   :  { %1244 = vmatprep.subr.bf16.mxu0 %v2460_v35 }
 0xa03   :  { %v1043_v5 = vpop.f32.mrb[20].mxu0 }
 0xa04   :  { %v1050_v15 = vadd.f32 %v1043_v5, %v2587_v60  ;;  %v1045_v17 = vpop.f32.mrb[21].mxu0  ;;  %v1340_v5 = vrot.slane %v2756_v18, 6 }
 0xa05   :  { %v1047_v7 = vpop.f32.mrb[22].mxu0 }
 0xa06   :  { %v1048_v19 = vpop.f32.mrb[23].mxu0  ;;  %v1051_v21 = vsel %vm532_vm0, %v1050_v15, -inf }
 0xa07   :  { %1052 = vmax.xlane.f32.xlu0 %v1051_v21  ;;  %v3092_v21 = vld [vmem:[#allocation16_spill] sm:$0xff] }
 0xa94   :  { %v1053_v23 = vpop.xlane.xlu0 %1052 }
 0xa95   :  { %v1054_v9 = vsub.f32 %v1050_v15, %v1053_v23 }
 0xa97   :  { %v1055_v25 = vmul.f32 1.442695, %v1054_v9 }
 0xa99   :  { %2136 = vpow2.f32 %v1055_v25 }
 0xaa3   :  { %v2137_v27 = vpop.eup %2136 }
 0xaa4   :  { %v1057_v29 = vsel %vm532_vm0, %v2137_v27, 0.0 }
 0xaa5   :  { %1058 = vadd.xlane.f32.xlu1 %v1057_v29 }
 0xb32   :  { %v1059_v31 = vpop.xlane.xlu1 %1058 }
 0xb33   :  { %2138 = vrcp.f32 %v1059_v31 }
 0xb3d   :  { %v2139_v35 = vpop.eup %2138 }
 0xb3e   :  { %v1061_v11 = vmul.f32 %v2139_v35, %v2137_v27 }
 0xb40   :  { %v1062_v13 = vpack.c.bf16 %v1061_v11, %v1061_v11 }
 0xb42   :  { %1900 = vmatmul.mubr.bf16.vlgmr.msra.gmra.mrb[20].mxu1 %v1062_v13 }
 0xb43   :  { %1149 = vmatpush1.bf16.msra.mxu1 %v2170_v54  ;;  %1180 = vmatprep.mubr.bf16.mxu1 %v3068_v59 }
 0xb44   :  { %1150 = vmatprep.subr.bf16.mxu1 %v2171_v33 }
 0xb47   :  { %1151 = vmatpush1.bf16.msra.mxu1 %v2172_v26 }
 0xb48   :  { %1152 = vmatprep.subr.bf16.mxu1 %v2173_v47 }
 0xb4b   :  { %1153 = vmatpush1.bf16.msra.mxu1 %v2174_v63 }
 0xb4c   :  { %1154 = vmatprep.subr.bf16.mxu1 %v2175_v55 }
 0xb4f   :  { %1155 = vmatpush1.bf16.msra.mxu1 %v2176_v22 }
 0xb50   :  { %1156 = vmatprep.subr.bf16.mxu1 %v2177_v56 }
 0xb53   :  { %1157 = vmatpush1.bf16.msra.mxu1 %v2178_v50 }
 0xb54   :  { %1158 = vmatprep.subr.bf16.mxu1 %v2179_v4 }
 0xb57   :  { %1159 = vmatpush1.bf16.msra.mxu1 %v2180_v8  ;;  %v2060_v8 = vld [vmem:[%s3021_s7] sm:$0xff]  }
 0xb58   :  { %1160 = vmatprep.subr.bf16.mxu1 %v2181_v10  ;;  %v2062_v10 = vld [vmem:[%s3021_s7 + $0x10] sm:$0xff]  }
 0xb5b   :  { %1161 = vmatpush1.bf16.msra.mxu1 %v2423_v28  ;;  %v1348_v28 = vsel %vm532_vm0, %v3092_v21, %v1340_v5  ;;  %v2064_v5 = vld [vmem:[%s3021_s7 + $0x20] sm:$0xff]  }
 0xb5c   :  { %1162 = vmatprep.subr.bf16.mxu1 %v2435_v30 }
 0xb5f   :  { %1163 = vmatpush1.bf16.msra.mxu1 %v2447_v32 }
 0xb60   :  { %1903 = vmatprep.subr.bf16.mxu1 %v3079_v6 }
 0xc15   :  { %v1097_v45 = vpop.f32.mrb[20].mxu1 }
 0xc16   :  { %v1098_v12 = vadd.f32 %v1097_v45, %v1045_v17  ;;  %v1901_v14 = vpop.f32.mrb[21].mxu1 }
 0xc17   :  { %v1100_v16 = vpop.f32.mrb[22].mxu1 }
 0xc18   :  { %2140 = vtanh.f32 %v1098_v12  ;;  %v1902_v20 = vpop.f32.mrb[23].mxu1 }
 0xc19   :  { %v2063_v20 = vld [vmem:[%s3021_s7 + $0x18] sm:$0xff]  }
 0xc22   :  { %v2141_v15 = vpop.eup %2140 }
 0xc23   :  { %v1343_v7 = vrot.slane %v2141_v15, 4  ;;  %v1106_v19 = vpack.c.bf16 %v2141_v15, %v2141_v15  ;;  %v2065_v15 = vld [vmem:[%s3021_s7 + $0x28] sm:$0xff]  }
 0xc25   :  { %1140 = vmatmul.mubr.bf16.vlgmr.msra.gmra.mrb[24].mxu0 %v1106_v19  ;;  %1181 = vmatmul.mubr.bf16.vlgmr.msra.gmra.mrb[24].mxu1 %v1106_v19  ;;  %v2881_v30 = vsel %vm1349_vm2, %v1348_v28, %v1343_v7  ;;  %v2066_v7 = vld [vmem:[%s3021_s7 + $0x30] sm:$0xff]   ;;  %v2067_v19 = vld [vmem:[%s3021_s7 + $0x38] sm:$0xff]  }
 0xc26   :  { %1245 = vmatpush1.bf16.msra.mxu0 %v2465_v36  ;;  %1276 = vmatprep.mubr.bf16.mxu0 %v3068_v59 }
 0xc27   :  { %1246 = vmatprep.subr.bf16.mxu0 %v2472_v37  ;;  %1904 = vmatpush3.bf16.msra.mxu1 %v2597_v34 }
 0xc28   :  { %1905 = vmatprep.subr.bf16.mxu1 %v3079_v6  ;;  %1919 = vmatprep.mubr.msk.bf16.mxu1 %vm2185_vm1, %v3079_v6 }
 0xc2a   :  { %1247 = vmatpush1.bf16.msra.mxu0 %v2477_v38 }
 0xc2b   :  { %1248 = vmatprep.subr.bf16.mxu0 %v2482_v39  ;;  %1906 = vmatpush3.bf16.msra.mxu1 %v2603_v49  ;;  %v1762_v49 = vld [vmem:[%s3017_s0 + $0x18] sm:$0xff] }
 0xc2c   :  { %1907 = vmatprep.subr.bf16.mxu1 %v3079_v6 }
 0xc2e   :  { %1249 = vmatpush1.bf16.msra.mxu0 %v2489_v40 }
 0xc2f   :  { %1250 = vmatprep.subr.bf16.mxu0 %v2495_v41  ;;  %1908 = vmatpush3.bf16.msra.mxu1 %v2610_v51 }
 0xc30   :  { %1909 = vmatprep.subr.bf16.mxu1 %v3079_v6 }
 0xc32   :  { %1251 = vmatpush1.bf16.msra.mxu0 %v2501_v42 }
 0xc33   :  { %1252 = vmatprep.subr.bf16.mxu0 %v2507_v43  ;;  %1910 = vmatpush3.bf16.msra.mxu1 %v2617_v52 }
 0xc34   :  { %1911 = vmatprep.subr.bf16.mxu1 %v3079_v6 }
 0xc36   :  { %1253 = vmatpush1.bf16.msra.mxu0 %v2513_v44 }
 0xc37   :  { %1254 = vmatprep.subr.bf16.mxu0 %v3080_v24  ;;  %1912 = vmatpush3.bf16.msra.mxu1 %v3081_v0 }
 0xc38   :  { %1913 = vmatprep.subr.bf16.mxu1 %v3079_v6 }
 0xc3a   :  { %1255 = vmatpush1.bf16.msra.mxu0 %v3082_v61 }
 0xc3b   :  { %1256 = vmatprep.subr.bf16.mxu0 %v3083_v46  ;;  %1914 = vmatpush3.bf16.msra.mxu1 %v3084_v62 }
 0xc3c   :  { %1915 = vmatprep.subr.bf16.mxu1 %v3079_v6 }
 0xc3e   :  { %1257 = vmatpush1.bf16.msra.mxu0 %v3085_v2 }
 0xc3f   :  { %1258 = vmatprep.subr.bf16.mxu0 %v3086_v57  ;;  %1916 = vmatpush3.bf16.msra.mxu1 %v3087_v1 }
 0xc40   :  { %1917 = vmatprep.subr.bf16.mxu1 %v3079_v6 }
 0xc42   :  { %1259 = vmatpush1.bf16.msra.mxu0 %v3088_v53 }
 0xc43   :  { %1918 = vmatpush3.bf16.msra.mxu1 %v3089_v3  ;;  %1923 = vmatprep.subr.bf16.mxu0 %v3079_v6 }
 0xc44   :  { %1943 = vmatprep.subr.bf16.mxu1 %v3079_v6 }
 0xcf8   :  { %v1141_v32 = vpop.f32.mrb[24].mxu0  ;;  %v1182_v36 = vpop.f32.mrb[24].mxu1 }
 0xcf9   :  { %v1143_v37 = vpop.f32.mrb[25].mxu0  ;;  %v1184_v38 = vpop.f32.mrb[25].mxu1 }
 0xcfa   :  { %v1193_v39 = vcombine.low %v1141_v32, %v1143_v37  ;;  %v1194_v40 = vcombine.low %v1182_v36, %v1184_v38  ;;  %v1145_v41 = vpop.f32.mrb[26].mxu0  ;;  %v1186_v42 = vpop.f32.mrb[26].mxu1 }
 0xcfb   :  { %v1146_v43 = vpop.f32.mrb[27].mxu0  ;;  %v1187_v44 = vpop.f32.mrb[27].mxu1  ;;  %v2068_v42 = vld [vmem:[%s3023_s8] sm:$0xff]  }
 0xcfc   :  { %v1201_v59 = vrot.slane %v1193_v39, %v2554_v58  ;;  %v1208_v34 = vrot.slane %v1194_v40, %v2554_v58  ;;  %v2069_v43 = vld [vmem:[%s3023_s8 + $0x8] sm:$0xff]  }
 0xcfe   :  { %v1209_v51 = vcombine.low %v1201_v59, %v1208_v34 }
 0xd00   :  { %v1211_v52 = vadd.f32 %v1762_v49, %v1209_v51 }
 0xd02   :  { %v1763_v18 = vmul.f32 -1.442695, %v1211_v52  ;;  %v1219_v24 = vrot.slane %v1211_v52, 2  ;;  %v1230_v61 = vrot.slane %v1211_v52, 6  ;;  %v1227_v2 = vrot.slane %v1211_v52, 4 }
 0xd04   :  { %2142 = vpow2.f32 %v1763_v18  ;;  %v1764_v0 = vmul.f32 -1.442695, %v1219_v24  ;;  %v1765_v46 = vmul.f32 -1.442695, %v1230_v61  ;;  %v1537_v18 = vld [vmem:[%s3024_s10] sm:$0xf] }
 0xd05   :  { %v1543_v61 = vsel %vm1349_vm2, %v1537_v18, 0 }
 0xd06   :  { %2144 = vpow2.f32 %v1764_v0 }
 0xd07   :  { %2146 = vpow2.f32 %v1765_v46  ;;  %v1774_v46 = vld [vmem:[%s3026_s9] ss:$0 sm:$0xff] }
 0xd0e   :  { %v2143_v62 = vpop.eup %2142 }
 0xd0f   :  { %v1215_v57 = vadd.f32 1.0, %v2143_v62 }
 0xd10   :  { %v2145_v1 = vpop.eup %2144 }
 0xd11   :  { %2148 = vrcp.f32 %v1215_v57  ;;  %v1224_v58 = vadd.f32 1.0, %v2145_v1  ;;  %v2147_v53 = vpop.eup %2146 }
 0xd12   :  { %2150 = vtanh.f32 %v1227_v2  ;;  %v1235_v9 = vadd.f32 1.0, %v2147_v53 }
 0xd13   :  { %2152 = vrcp.f32 %v1224_v58  ;;  %v2070_v58 = vld [vmem:[%s3025_s11] sm:$0xff]  }
 0xd14   :  { %2154 = vrcp.f32 %v1235_v9  ;;  %v2073_v9 = vld [vmem:[%s3025_s11 + $0x18] sm:$0xff]  }
 0xd1b   :  { %v2149_v3 = vpop.eup %2148 }
 0xd1c   :  { %v2151_v17 = vpop.eup %2150 }
 0xd1d   :  { %v2153_v23 = vpop.eup %2152  ;;  %v1239_v27 = vmul.f32 %v2151_v17, %v2149_v3  ;;  %v2071_v17 = vld [vmem:[%s3025_s11 + $0x8] sm:$0xff]  }
 0xd1e   :  { %v1238_v25 = vmul.f32 %v2153_v23, %v2801_v48  ;;  %v2155_v31 = vpop.eup %2154  ;;  %v2072_v23 = vld [vmem:[%s3025_s11 + $0x10] sm:$0xff]  }
 0xd20   :  { %v1240_v29 = vadd.f32 %v1239_v27, %v1238_v25  ;;  %v2074_v25 = vld [vmem:[%s3025_s11 + $0x20] sm:$0xff]   ;;  %v2075_v27 = vld [vmem:[%s3025_s11 + $0x28] sm:$0xff]  }
 0xd22   :  { %2156 = vtanh.f32 %v1240_v29 }
 0xd2c   :  { %v2157_v35 = vpop.eup %2156 }
 0xd2d   :  { %v1242_v11 = vmul.f32 %v2157_v35, %v2155_v31 }
 0xd2f   :  { %v1243_v13 = vpack.c.bf16 %v1242_v11, %v1242_v11 }
 0xd31   :  { %1277 = vmatmul.mubr.bf16.vlgmr.msra.gmra.mrb[28].mxu0 %v1243_v13 }
 0xd32   :  { %1939 = vmatprep.mubr.msk.bf16.mxu0 %vm2185_vm1, %v3079_v6  ;;  %1924 = vmatpush3.bf16.msra.mxu0 %v2060_v8 }
 0xd33   :  { %1925 = vmatprep.subr.bf16.mxu0 %v3079_v6 }
 0xe04   :  { %v1278_v54 = vpop.f32.mrb[28].mxu0 }
 0xe05   :  { %v1285_v33 = vadd.f32 %v1278_v54, %v2587_v60  ;;  %v1280_v26 = vpop.f32.mrb[29].mxu0  ;;  %v2061_v60 = vld [vmem:[%s3021_s7 + $0x8] sm:$0xff]  }
 0xe06   :  { %v1282_v47 = vpop.f32.mrb[30].mxu0  ;;  %1926 = vmatpush3.bf16.msra.mxu0 %v2061_v60 }
 0xe07   :  { %v1283_v63 = vpop.f32.mrb[31].mxu0  ;;  %v1286_v48 = vsel %vm532_vm0, %v1285_v33, -inf  ;;  %1927 = vmatprep.subr.bf16.mxu0 %v3079_v6 }
 0xe08   :  { %1287 = vmax.xlane.f32.xlu0 %v1286_v48 }
 0xe0a   :  { %1928 = vmatpush3.bf16.msra.mxu0 %v2062_v10 }
 0xe0b   :  { %1929 = vmatprep.subr.bf16.mxu0 %v3079_v6 }
 0xe0e   :  { %1930 = vmatpush3.bf16.msra.mxu0 %v2063_v20 }
 0xe0f   :  { %1931 = vmatprep.subr.bf16.mxu0 %v3079_v6 }
 0xe12   :  { %1932 = vmatpush3.bf16.msra.mxu0 %v2064_v5 }
 0xe13   :  { %1933 = vmatprep.subr.bf16.mxu0 %v3079_v6 }
 0xe16   :  { %1934 = vmatpush3.bf16.msra.mxu0 %v2065_v15 }
 0xe17   :  { %1935 = vmatprep.subr.bf16.mxu0 %v3079_v6 }
 0xe1a   :  { %1936 = vmatpush3.bf16.msra.mxu0 %v2066_v7 }
 0xe1b   :  { %1937 = vmatprep.subr.bf16.mxu0 %v3079_v6 }
 0xe1e   :  { %1938 = vmatpush3.bf16.msra.mxu0 %v2067_v19 }
 0xe95   :  { %v1288_v55 = vpop.xlane.xlu0 %1287 }
 0xe96   :  { %v1289_v22 = vsub.f32 %v1285_v33, %v1288_v55 }
 0xe98   :  { %v1290_v56 = vmul.f32 1.442695, %v1289_v22 }
 0xe9a   :  { %2158 = vpow2.f32 %v1290_v56 }
 0xea4   :  { %v2159_v50 = vpop.eup %2158 }
 0xea5   :  { %v1292_v4 = vsel %vm532_vm0, %v2159_v50, 0.0 }
 0xea6   :  { %1293 = vadd.xlane.f32.xlu1 %v1292_v4 }
 0xf33   :  { %v1294_v45 = vpop.xlane.xlu1 %1293 }
 0xf34   :  { %2160 = vrcp.f32 %v1294_v45 }
 0xf3e   :  { %v2161_v12 = vpop.eup %2160 }
 0xf3f   :  { %v1296_v14 = vmul.f32 %v2161_v12, %v2159_v50 }
 0xf41   :  { %v1297_v16 = vpack.c.bf16 %v1296_v14, %v1296_v14 }
 0xf43   :  { %1920 = vmatmul.mubr.bf16.vlgmr.msra.gmra.mrb[28].mxu1 %v1297_v16 }
 0xf44   :  { %1947 = vmatprep.mubr.msk.bf16.mxu1 %vm2185_vm1, %v3079_v6  ;;  %1944 = vmatpush3.bf16.msra.mxu1 %v2068_v42 }
 0xf45   :  { %1945 = vmatprep.subr.bf16.mxu1 %v3079_v6 }
 0xf48   :  { %1946 = vmatpush3.bf16.msra.mxu1 %v2069_v43 }
 0xf49   :  { %1951 = vmatprep.subr.bf16.mxu1 %v3079_v6 }
0x1016   :  { %v1332_v21 = vpop.f32.mrb[28].mxu1 }
0x1017   :  { %v1333_v28 = vadd.f32 %v1332_v21, %v1280_v26  ;;  %v1921_v32 = vpop.f32.mrb[29].mxu1 }
0x1018   :  { %v1335_v36 = vpop.f32.mrb[30].mxu1 }
0x1019   :  { %2162 = vtanh.f32 %v1333_v28  ;;  %v1922_v37 = vpop.f32.mrb[31].mxu1 }
0x1023   :  { %v2163_v38 = vpop.eup %2162 }
0x1024   :  { %v1346_v39 = vrot.slane %v2163_v38, 2 }
0x1026   :  { %v1352_v40 = vsel %vm1351_vm3, %v2881_v30, %v1346_v39 }
0x1027   :  { %1353 = vst [vmem:[%s3022_s12] sm:$0xff] %v1352_v40  ;;  %v1354_v41 = vpack.c.bf16 %v1352_v40, %v1352_v40  ;;  %s2187_s12 = smov 96  }
0x1029   :  { %1940 = vmatmul.mubr.bf16.vlgmr.msra.gmra.mrb[32].mxu0 %v1354_v41 }
0x10fc   :  { %v1453_v30 = vpop.f32.mrb[32].mxu0 }
0x10fd   :  { %1464 = vrot.lane.b32.xlu1 %v1453_v30, %s2186_s15  ;;  %1460 = vrot.lane.b32.xlu0 %v1453_v30, %s2187_s12  ;;  %v1941_v44 = vpop.f32.mrb[33].mxu0 }
0x10fe   :  { %v1456_v59 = vpop.f32.mrb[34].mxu0 }
0x10ff   :  { %v1942_v34 = vpop.f32.mrb[35].mxu0 }
0x116f   :  { %v1461_v49 = vpop.permute.xlu0 %1460  ;;  %v1465_v52 = vpop.permute.xlu1 %1464 }
0x1170   :  { %v1463_v51 = vadd.f32 %v1461_v49, %v1453_v30 }
0x1172   :  { %v1467_v24 = vadd.f32 %v1465_v52, %v1463_v51 }
0x1174   :  { %v1468_v0 = vpack.c.bf16 %v1467_v24, %v1467_v24 }
0x1176   :  { %1948 = vmatmul.mubr.msk.bf16.vlgmr.msra.gmra.mrb[32].mxu1 %vm1492_vm4, %v1468_v0 }
0x1177   :  { %1952 = vmatpush3.bf16.msra.mxu1 %v1543_v61  ;;  %1953 = vmatprep.mubr.msk.bf16.mxu1 %vm2185_vm1, %v3079_v6 }
0x1178   :  { %1957 = vmatprep.subr.bf16.mxu1 %v3079_v6 }
0x1249   :  { %v1530_v62 = vpop.f32.mrb[32].mxu1 }
0x124a   :  { %v1531_v2 = vadd.f32 %v1774_v46, %v1530_v62  ;;  %v1949_v57 = vpop.f32.mrb[33].mxu1 }
0x124b   :  { %v1533_v1 = vpop.f32.mrb[34].mxu1 }
0x124c   :  { %v1536_v53 = vpack.c.bf16 %v1531_v2, %v1531_v2  ;;  %v1950_v3 = vpop.f32.mrb[35].mxu1 }
0x124e   :  { %1954 = vmatmul.mubr.msk.bf16.vlgmr.msra.gmra.mrb[36].mxu1 %vm1538_vm5, %v1536_v53 }
0x124f   :  { %1958 = vmatpush3.bf16.msra.mxu1 %v2070_v58  ;;  %1969 = vmatprep.mubr.msk.bf16.mxu1 %vm2185_vm1, %v3079_v6 }
0x1250   :  { %1959 = vmatprep.subr.bf16.mxu1 %v3079_v6 }
0x1253   :  { %1960 = vmatpush3.bf16.msra.mxu1 %v2071_v17 }
0x1254   :  { %1961 = vmatprep.subr.bf16.mxu1 %v3079_v6 }
0x1257   :  { %1962 = vmatpush3.bf16.msra.mxu1 %v2072_v23 }
0x1258   :  { %1963 = vmatprep.subr.bf16.mxu1 %v3079_v6 }
0x125b   :  { %1964 = vmatpush3.bf16.msra.mxu1 %v2073_v9 }
0x125c   :  { %1965 = vmatprep.subr.bf16.mxu1 %v3079_v6 }
0x125f   :  { %1966 = vmatpush3.bf16.msra.mxu1 %v2074_v25 }
0x1260   :  { %1967 = vmatprep.subr.bf16.mxu1 %v3079_v6 }
0x1263   :  { %1968 = vmatpush3.bf16.msra.mxu1 %v2075_v27 }
0x1321   :  { %v1579_v29 = vpop.f32.mrb[36].mxu1 }
0x1322   :  { %v1585_v31 = vmul.f32 %v1579_v29, %v1453_v30  ;;  %v1955_v35 = vpop.f32.mrb[37].mxu1 }
0x1323   :  { %v1582_v11 = vpop.f32.mrb[38].mxu1 }
0x1324   :  { %v1586_v13 = vpack.c.bf16 %v1585_v31, %v1585_v31  ;;  %v1956_v54 = vpop.f32.mrb[39].mxu1 }
0x1326   :  { %1970 = vmatmul.mubr.msk.bf16.vlgmr.msra.gmra.mrb[40].mxu1 %vm1635_vm6, %v1586_v13 }
0x13f9   :  { %v1673_v33 = vpop.f32.mrb[40].mxu1 }
0x13fa   :  { %1680 = vrot.lane.b32.xlu1 %v1673_v33, %s2188_s24  ;;  %v1971_v26 = vpop.f32.mrb[41].mxu1 }
0x13fb   :  { %v1676_v47 = vpop.f32.mrb[42].mxu1 }
0x13fc   :  { %v1972_v63 = vpop.f32.mrb[43].mxu1 }
0x146c   :  { %v1681_v6 = vpop.permute.xlu1 %1680 }
0x146d   :  { %v1683_v48 = vsel %vm1538_vm5, %v1531_v2, %v1681_v6 }
0x146e   :  { %v1685_v55 = vsel %vm1684_vm7, %v1683_v48, 0.0 }
0x146f   :  { %1686 = vst [vmem:[%s3027_s13] sm:$0xff] %v1685_v55 }

</bundles_post_ra>
